<compile_context>
chip_gen: v7x
topology: tpu7x:2x2x1
jax: 0.10.0
libtpu: 0.0.40
codegen_flags: <defaults>
</compile_context>

<pallas_src>
import jax
import jax.numpy as jnp
from jax.experimental import pallas as pl
from jax.experimental.pallas import tpu as pltpu

EPS = 1e-5


def _bn_kernel(x_ref, gamma_ref, beta_ref, o_ref):
    # x_ref: (C_blk, M), gamma/beta: (C_blk, 1)
    x = x_ref[...].astype(jnp.float32)
    m = x.shape[1]
    inv_m = 1.0 / m                                        # static -> multiply, no vector divide

    # Two-pass (centered) statistics: matches jnp.var / PyTorch BN normalization
    # (biased variance) and is numerically tighter than E[x^2]-mean^2.
    mean = jnp.sum(x, axis=1, keepdims=True) * inv_m       # (C_blk, 1)  cross-lane reduce
    xc = x - mean
    var = jnp.sum(xc * xc, axis=1, keepdims=True) * inv_m  # (C_blk, 1)
    scale = gamma_ref[...] * jax.lax.rsqrt(var + EPS)      # (C_blk, 1)  EUP rsqrt
    o_ref[...] = (xc * scale + beta_ref[...]).astype(o_ref.dtype)


def batchnorm2d_pallas(x_nchw, gamma, beta, *, c_block=None):
    N, C, H, W = x_nchw.shape
    m = N * H * W

    # Present as (C, N*H*W).  For N == 1 this is a pure reshape (no data movement
    # outside the kernel).  For N > 1 a channel-major transpose is required.
    if N == 1:
        x_cm = x_nchw.reshape(C, m)
    else:
        x_cm = jnp.transpose(x_nchw, (1, 0, 2, 3)).reshape(C, m)

    gamma2 = gamma.reshape(C, 1).astype(jnp.float32)
    beta2 = beta.reshape(C, 1).astype(jnp.float32)

    if c_block is None:
        # Single block while (in+out, double-buffered) stays within a few MiB of
        # VMEM; otherwise tile channels in sublane-aligned blocks.
        c_block = C
        budget = 4 * 1024 * 1024
        while c_block > 8 and 2 * c_block * m * 4 > budget and c_block % 2 == 0:
            c_block //= 2
    assert C % c_block == 0 and c_block % 8 == 0
    grid = (C // c_block,)

    # TODO(synk): for production-size inputs (e.g. N=32, H=W=56 -> N*H*W ~ 100K),
    # add a second grid axis tiling N*H*W with partial-sum accumulation so each
    # block stays in the few-MiB VMEM sweet spot.
    out_cm = pl.pallas_call(
        _bn_kernel,
        out_shape=jax.ShapeDtypeStruct((C, m), x_nchw.dtype),
        grid=grid,
        in_specs=[
            pl.BlockSpec((c_block, m), lambda i: (i, 0)),
            pl.BlockSpec((c_block, 1), lambda i: (i, 0)),
            pl.BlockSpec((c_block, 1), lambda i: (i, 0)),
        ],
        out_specs=pl.BlockSpec((c_block, m), lambda i: (i, 0)),
        compiler_params=pltpu.CompilerParams(
            dimension_semantics=("parallel",),
        ),
    )(x_cm, gamma2, beta2)

    if N == 1:
        return out_cm.reshape(N, C, H, W)
    return jnp.transpose(out_cm.reshape(C, N, H, W), (1, 0, 2, 3))


def batchnorm2d_ref(x_nchw, gamma, beta):
    mean = jnp.mean(x_nchw, axis=(0, 2, 3), keepdims=True)
    var = jnp.var(x_nchw, axis=(0, 2, 3), keepdims=True)
    g = gamma.reshape(1, -1, 1, 1)
    b = beta.reshape(1, -1, 1, 1)
    return (x_nchw - mean) * jax.lax.rsqrt(var + EPS) * g + b


if __name__ == "__main__":
    key = jax.random.PRNGKey(0)
    kx, kg, kb = jax.random.split(key, 3)

    # Shape from the module's sample input: [1, 512, 7, 7]
    N, C, H, W = 1, 512, 7, 7
    x = jax.random.normal(kx, (N, C, H, W), dtype=jnp.float32)
    # PyTorch init would be ones/zeros; use random affine params for a non-trivial test.
    gamma = 1.0 + 0.1 * jax.random.normal(kg, (C,), dtype=jnp.float32)
    beta = 0.1 * jax.random.normal(kb, (C,), dtype=jnp.float32)

    out = batchnorm2d_pallas(x, gamma, beta)
    out = jax.block_until_ready(out)

    ref = batchnorm2d_ref(x, gamma, beta)
    assert out.shape == (N, C, H, W)
    assert jnp.allclose(out, ref, atol=1e-4, rtol=1e-4)

    # TODO(synk): running_mean/running_var update (momentum=0.1) is training-state
    # bookkeeping that does not affect the forward output; not materialized here.
    print("KERNEL_OK")
</pallas_src>

<mosaic_0001>
module attributes {stable_mosaic.version = 11 : i64} {
  func.func @_bn_kernel(%arg0: i32, %arg1: memref<512x49xf32, #tpu.memory_space<vmem>>, %arg2: memref<512x1xf32, #tpu.memory_space<vmem>>, %arg3: memref<512x1xf32, #tpu.memory_space<vmem>>, %arg4: memref<512x49xf32, #tpu.memory_space<vmem>>) attributes {dimension_semantics = [#tpu.dimension_semantics<parallel>], iteration_bounds = array<i64: 1>, scalar_prefetch = 0 : i64, scratch_operands = 0 : i64, tpu.core_type = #tpu.core_type<tc>, window_params = [{transform_indices = @transform_0, window_bounds = array<i64: 512, 49>}, {transform_indices = @transform_1, window_bounds = array<i64: 512, 1>}, {transform_indices = @transform_2, window_bounds = array<i64: 512, 1>}, {transform_indices = @transform_3, window_bounds = array<i64: 512, 49>}]} {
    %c0 = arith.constant 0 : index
    %c0_0 = arith.constant 0 : index
    %0 = vector.load %arg1[%c0, %c0_0] : memref<512x49xf32, #tpu.memory_space<vmem>>, vector<512x49xf32>
    %cst = arith.constant dense<0.000000e+00> : vector<512xf32>
    %1 = vector.multi_reduction <add>, %0, %cst [1] : vector<512x49xf32> to vector<512xf32>
    %2 = vector.shape_cast %1 : vector<512xf32> to vector<512x1xf32>
    %cst_1 = arith.constant 0.0204081628 : f32
    %3 = vector.broadcast %cst_1 : f32 to vector<512x1xf32>
    %4 = arith.mulf %2, %3 : vector<512x1xf32>
    %5 = vector.broadcast %4 : vector<512x1xf32> to vector<512x49xf32>
    %6 = arith.subf %0, %5 : vector<512x49xf32>
    %7 = arith.mulf %6, %6 : vector<512x49xf32>
    %cst_2 = arith.constant dense<0.000000e+00> : vector<512xf32>
    %8 = vector.multi_reduction <add>, %7, %cst_2 [1] : vector<512x49xf32> to vector<512xf32>
    %9 = vector.shape_cast %8 : vector<512xf32> to vector<512x1xf32>
    %cst_3 = arith.constant 0.0204081628 : f32
    %10 = vector.broadcast %cst_3 : f32 to vector<512x1xf32>
    %11 = arith.mulf %9, %10 : vector<512x1xf32>
    %c0_4 = arith.constant 0 : index
    %c0_5 = arith.constant 0 : index
    %12 = vector.load %arg2[%c0_4, %c0_5] : memref<512x1xf32, #tpu.memory_space<vmem>>, vector<512x1xf32>
    %cst_6 = arith.constant 9.99999974E-6 : f32
    %13 = vector.broadcast %cst_6 : f32 to vector<512x1xf32>
    %14 = arith.addf %11, %13 : vector<512x1xf32>
    %15 = math.rsqrt %14 : vector<512x1xf32>
    %16 = arith.mulf %12, %15 : vector<512x1xf32>
    %17 = vector.broadcast %16 : vector<512x1xf32> to vector<512x49xf32>
    %18 = arith.mulf %6, %17 : vector<512x49xf32>
    %c0_7 = arith.constant 0 : index
    %c0_8 = arith.constant 0 : index
    %19 = vector.load %arg3[%c0_7, %c0_8] : memref<512x1xf32, #tpu.memory_space<vmem>>, vector<512x1xf32>
    %20 = vector.broadcast %19 : vector<512x1xf32> to vector<512x49xf32>
    %21 = arith.addf %18, %20 : vector<512x49xf32>
    %c0_9 = arith.constant 0 : index
    %c0_10 = arith.constant 0 : index
    %22 = vector.load %arg4[%c0_9, %c0_10] : memref<512x49xf32, #tpu.memory_space<vmem>>, vector<512x49xf32>
    tpu.vector_store %arg4[%c0_9, %c0_10], %21 {strides = array<i32>} : memref<512x49xf32, #tpu.memory_space<vmem>>, vector<512x49xf32>,
    return
  }
  func.func @transform_0(%arg0: i32) -> (i32, i32) {
    %c0_i32 = arith.constant 0 : i32
    %c0_i32_0 = arith.constant 0 : i32
    return %arg0, %c0_i32 : i32, i32
  }
  func.func @transform_1(%arg0: i32) -> (i32, i32) {
    %c0_i32 = arith.constant 0 : i32
    %c0_i32_0 = arith.constant 0 : i32
    return %arg0, %c0_i32 : i32, i32
  }
  func.func @transform_2(%arg0: i32) -> (i32, i32) {
    %c0_i32 = arith.constant 0 : i32
    %c0_i32_0 = arith.constant 0 : i32
    return %arg0, %c0_i32 : i32, i32
  }
  func.func @transform_3(%arg0: i32) -> (i32, i32) {
    %c0_i32 = arith.constant 0 : i32
    %c0_i32_0 = arith.constant 0 : i32
    return %arg0, %c0_i32 : i32, i32
  }
}

</mosaic_0001>

<bundles_post_ra>
// kernel: tpu_custom_call.1
= control target key start
LH: loop header
LB: loop body
LE: loop exit
PB: predicated region body
PF: predicated region fallthrough
CT: control target
= control target key end

     0   :  { %vm78_vm0 = vcmask 400384   ;;  %s3755_s0 = inlined_call_operand.vmem [shape: f32[512,49], index: 0, kind: input, shape index: {}]   ;;  %s3756_s1 = inlined_call_operand.vmem [shape: f32[512,1], index: 1, kind: input, shape index: {}]   ;;  %s3757_s2 = inlined_call_operand.vmem [shape: f32[512,1], index: 2, kind: input, shape index: {}]   ;;  %s3758_s3 = inlined_call_operand.vmem [shape: f32[512,49], index: 3, kind: output, shape index: {}]  }
   0x1   :  { %v2030_v0 = vld [vmem:[%s3755_s0] sm:$0xff]  ;;  %v2035_v1 = vld [vmem:[%s3755_s0 + $0x10] sm:$0xff]  ;;  %v2040_v2 = vld [vmem:[%s3755_s0 + $0x8] sm:$0xff] }
   0x2   :  { %v79_v3 = vsel %vm78_vm0, %v2030_v0, 0.0  ;;  %v85_v4 = vsel %vm78_vm0, %v2035_v1, 0.0  ;;  %v2049_v5 = vld [vmem:[%s3755_s0 + $0x18] sm:$0xff]  ;;  %v82_v6 = vsel %vm78_vm0, %v2040_v2, 0.0  ;;  %v2058_v8 = vld [vmem:[%s3755_s0 + $0x28] sm:$0xff]  ;;  %v2063_v9 = vld [vmem:[%s3755_s0 + $0x20] sm:$0xff] }
   0x3   :  { %80 = vadd.xlane.f32.xlu0 %v79_v3  ;;  %86 = vadd.xlane.f32.xlu1 %v85_v4  ;;  %v88_v7 = vsel %vm78_vm0, %v2049_v5, 0.0  ;;  %v94_v10 = vsel %vm78_vm0, %v2058_v8, 0.0  ;;  %v91_v11 = vsel %vm78_vm0, %v2063_v9, 0.0  ;;  %v2072_v12 = vld [vmem:[%s3755_s0 + $0x38] sm:$0xff]  ;;  %v2077_v13 = vld [vmem:[%s3755_s0 + $0x30] sm:$0xff]  ;;  %v2086_v16 = vld [vmem:[%s3755_s0 + $0x48] sm:$0xff] }
   0x4   :  { %v100_v14 = vsel %vm78_vm0, %v2072_v12, 0.0  ;;  %v97_v15 = vsel %vm78_vm0, %v2077_v13, 0.0  ;;  %v2091_v17 = vld [vmem:[%s3755_s0 + $0x40] sm:$0xff]  ;;  %v106_v18 = vsel %vm78_vm0, %v2086_v16, 0.0  ;;  %v2100_v20 = vld [vmem:[%s3755_s0 + $0x58] sm:$0xff]  ;;  %v2105_v21 = vld [vmem:[%s3755_s0 + $0x50] sm:$0xff] }
   0x5   :  { %v103_v19 = vsel %vm78_vm0, %v2091_v17, 0.0  ;;  %v112_v22 = vsel %vm78_vm0, %v2100_v20, 0.0  ;;  %v109_v23 = vsel %vm78_vm0, %v2105_v21, 0.0  ;;  %v2114_v24 = vld [vmem:[%s3755_s0 + $0x68] sm:$0xff]  ;;  %v2119_v25 = vld [vmem:[%s3755_s0 + $0x60] sm:$0xff]  ;;  %v2128_v28 = vld [vmem:[%s3755_s0 + $0x78] sm:$0xff] }
   0x6   :  { %v118_v26 = vsel %vm78_vm0, %v2114_v24, 0.0  ;;  %v115_v27 = vsel %vm78_vm0, %v2119_v25, 0.0  ;;  %v2133_v29 = vld [vmem:[%s3755_s0 + $0x70] sm:$0xff]  ;;  %v124_v30 = vsel %vm78_vm0, %v2128_v28, 0.0  ;;  %v2142_v32 = vld [vmem:[%s3755_s0 + $0x88] sm:$0xff]  ;;  %v2147_v33 = vld [vmem:[%s3755_s0 + $0x80] sm:$0xff] }
   0x7   :  { %83 = vadd.xlane.f32.xlu0 %v82_v6  ;;  %89 = vadd.xlane.f32.xlu1 %v88_v7  ;;  %v121_v31 = vsel %vm78_vm0, %v2133_v29, 0.0  ;;  %v130_v34 = vsel %vm78_vm0, %v2142_v32, 0.0  ;;  %v127_v35 = vsel %vm78_vm0, %v2147_v33, 0.0  ;;  %v2156_v36 = vld [vmem:[%s3755_s0 + $0x98] sm:$0xff]  ;;  %v2161_v37 = vld [vmem:[%s3755_s0 + $0x90] sm:$0xff]  ;;  %v2170_v40 = vld [vmem:[%s3755_s0 + $0xa8] sm:$0xff] }
   0x8   :  { %v136_v38 = vsel %vm78_vm0, %v2156_v36, 0.0  ;;  %v133_v39 = vsel %vm78_vm0, %v2161_v37, 0.0  ;;  %v2175_v41 = vld [vmem:[%s3755_s0 + $0xa0] sm:$0xff]  ;;  %v142_v42 = vsel %vm78_vm0, %v2170_v40, 0.0  ;;  %v2184_v44 = vld [vmem:[%s3755_s0 + $0xb8] sm:$0xff]  ;;  %v2189_v45 = vld [vmem:[%s3755_s0 + $0xb0] sm:$0xff] }
   0x9   :  { %v139_v43 = vsel %vm78_vm0, %v2175_v41, 0.0  ;;  %v148_v46 = vsel %vm78_vm0, %v2184_v44, 0.0  ;;  %v145_v47 = vsel %vm78_vm0, %v2189_v45, 0.0  ;;  %v2198_v48 = vld [vmem:[%s3755_s0 + $0xc8] sm:$0xff]  ;;  %v2203_v49 = vld [vmem:[%s3755_s0 + $0xc0] sm:$0xff]  ;;  %v2212_v52 = vld [vmem:[%s3755_s0 + $0xd8] sm:$0xff] }
   0xa   :  { %v154_v50 = vsel %vm78_vm0, %v2198_v48, 0.0  ;;  %v151_v51 = vsel %vm78_vm0, %v2203_v49, 0.0  ;;  %v2217_v53 = vld [vmem:[%s3755_s0 + $0xd0] sm:$0xff]  ;;  %v160_v54 = vsel %vm78_vm0, %v2212_v52, 0.0  ;;  %v2226_v56 = vld [vmem:[%s3755_s0 + $0xe8] sm:$0xff]  ;;  %v2231_v57 = vld [vmem:[%s3755_s0 + $0xe0] sm:$0xff] }
   0xb   :  { %95 = vadd.xlane.f32.xlu1 %v94_v10  ;;  %92 = vadd.xlane.f32.xlu0 %v91_v11  ;;  %v157_v55 = vsel %vm78_vm0, %v2217_v53, 0.0  ;;  %v166_v58 = vsel %vm78_vm0, %v2226_v56, 0.0  ;;  %v163_v59 = vsel %vm78_vm0, %v2231_v57, 0.0  ;;  %v2240_v60 = vld [vmem:[%s3755_s0 + $0xf8] sm:$0xff]  ;;  %v2245_v61 = vld [vmem:[%s3755_s0 + $0xf0] sm:$0xff]  ;;  %v2254_v3 = vld [vmem:[%s3755_s0 + $0x108] sm:$0xff] }
   0xc   :  { %v172_v62 = vsel %vm78_vm0, %v2240_v60, 0.0  ;;  %v169_v63 = vsel %vm78_vm0, %v2245_v61, 0.0  ;;  %v2259_v4 = vld [vmem:[%s3755_s0 + $0x100] sm:$0xff]  ;;  %v178_v6 = vsel %vm78_vm0, %v2254_v3, 0.0  ;;  %v2268_v10 = vld [vmem:[%s3755_s0 + $0x118] sm:$0xff]  ;;  %v2273_v11 = vld [vmem:[%s3755_s0 + $0x110] sm:$0xff] }
   0xd   :  { %v175_v7 = vsel %vm78_vm0, %v2259_v4, 0.0 }
   0xf   :  { %101 = vadd.xlane.f32.xlu1 %v100_v14  ;;  %98 = vadd.xlane.f32.xlu0 %v97_v15  ;;  %v184_v14 = vsel %vm78_vm0, %v2268_v10, 0.0  ;;  %v181_v15 = vsel %vm78_vm0, %v2273_v11, 0.0 }
  0x13   :  { %107 = vadd.xlane.f32.xlu1 %v106_v18  ;;  %104 = vadd.xlane.f32.xlu0 %v103_v19  ;;  %v2282_v18 = vld [vmem:[%s3755_s0 + $0x128] sm:$0xff]  ;;  %v2287_v19 = vld [vmem:[%s3755_s0 + $0x120] sm:$0xff] }
  0x17   :  { %113 = vadd.xlane.f32.xlu1 %v112_v22  ;;  %110 = vadd.xlane.f32.xlu0 %v109_v23  ;;  %v190_v22 = vsel %vm78_vm0, %v2282_v18, 0.0  ;;  %v187_v23 = vsel %vm78_vm0, %v2287_v19, 0.0 }
  0x1b   :  { %119 = vadd.xlane.f32.xlu1 %v118_v26  ;;  %116 = vadd.xlane.f32.xlu0 %v115_v27  ;;  %v2296_v26 = vld [vmem:[%s3755_s0 + $0x138] sm:$0xff]  ;;  %v2301_v27 = vld [vmem:[%s3755_s0 + $0x130] sm:$0xff] }
  0x1f   :  { %125 = vadd.xlane.f32.xlu1 %v124_v30  ;;  %122 = vadd.xlane.f32.xlu0 %v121_v31  ;;  %v196_v30 = vsel %vm78_vm0, %v2296_v26, 0.0  ;;  %v193_v31 = vsel %vm78_vm0, %v2301_v27, 0.0 }
  0x23   :  { %131 = vadd.xlane.f32.xlu1 %v130_v34  ;;  %128 = vadd.xlane.f32.xlu0 %v127_v35  ;;  %v2310_v34 = vld [vmem:[%s3755_s0 + $0x148] sm:$0xff]  ;;  %v2315_v35 = vld [vmem:[%s3755_s0 + $0x140] sm:$0xff] }
  0x27   :  { %137 = vadd.xlane.f32.xlu1 %v136_v38  ;;  %134 = vadd.xlane.f32.xlu0 %v133_v39  ;;  %v202_v38 = vsel %vm78_vm0, %v2310_v34, 0.0  ;;  %v199_v39 = vsel %vm78_vm0, %v2315_v35, 0.0 }
  0x2b   :  { %143 = vadd.xlane.f32.xlu1 %v142_v42  ;;  %140 = vadd.xlane.f32.xlu0 %v139_v43  ;;  %v2324_v42 = vld [vmem:[%s3755_s0 + $0x158] sm:$0xff]  ;;  %v2329_v43 = vld [vmem:[%s3755_s0 + $0x150] sm:$0xff] }
  0x2f   :  { %149 = vadd.xlane.f32.xlu1 %v148_v46  ;;  %146 = vadd.xlane.f32.xlu0 %v145_v47  ;;  %v208_v46 = vsel %vm78_vm0, %v2324_v42, 0.0  ;;  %v205_v47 = vsel %vm78_vm0, %v2329_v43, 0.0 }
  0x33   :  { %155 = vadd.xlane.f32.xlu1 %v154_v50  ;;  %152 = vadd.xlane.f32.xlu0 %v151_v51  ;;  %v2338_v50 = vld [vmem:[%s3755_s0 + $0x168] sm:$0xff]  ;;  %v2343_v51 = vld [vmem:[%s3755_s0 + $0x160] sm:$0xff] }
  0x37   :  { %161 = vadd.xlane.f32.xlu1 %v160_v54  ;;  %158 = vadd.xlane.f32.xlu0 %v157_v55  ;;  %v214_v54 = vsel %vm78_vm0, %v2338_v50, 0.0  ;;  %v211_v55 = vsel %vm78_vm0, %v2343_v51, 0.0 }
  0x3b   :  { %167 = vadd.xlane.f32.xlu1 %v166_v58  ;;  %164 = vadd.xlane.f32.xlu0 %v163_v59  ;;  %v2352_v58 = vld [vmem:[%s3755_s0 + $0x178] sm:$0xff]  ;;  %v2357_v59 = vld [vmem:[%s3755_s0 + $0x170] sm:$0xff] }
  0x3f   :  { %173 = vadd.xlane.f32.xlu1 %v172_v62  ;;  %170 = vadd.xlane.f32.xlu0 %v169_v63  ;;  %v220_v62 = vsel %vm78_vm0, %v2352_v58, 0.0  ;;  %v217_v63 = vsel %vm78_vm0, %v2357_v59, 0.0 }
  0x43   :  { %179 = vadd.xlane.f32.xlu1 %v178_v6  ;;  %176 = vadd.xlane.f32.xlu0 %v175_v7  ;;  %v2366_v6 = vld [vmem:[%s3755_s0 + $0x188] sm:$0xff]  ;;  %v2371_v7 = vld [vmem:[%s3755_s0 + $0x180] sm:$0xff] }
  0x47   :  { %185 = vadd.xlane.f32.xlu1 %v184_v14  ;;  %182 = vadd.xlane.f32.xlu0 %v181_v15  ;;  %v226_v14 = vsel %vm78_vm0, %v2366_v6, 0.0  ;;  %v223_v15 = vsel %vm78_vm0, %v2371_v7, 0.0 }
  0x4b   :  { %191 = vadd.xlane.f32.xlu1 %v190_v22  ;;  %188 = vadd.xlane.f32.xlu0 %v187_v23  ;;  %v2380_v22 = vld [vmem:[%s3755_s0 + $0x198] sm:$0xff]  ;;  %v2385_v23 = vld [vmem:[%s3755_s0 + $0x190] sm:$0xff] }
  0x4c   :  { %3809 = vst [vmem:[#allocation2_spill] sm:$0xff] %v2380_v22  ;;  %3810 = vst [vmem:[#allocation3_spill] sm:$0xff] %v2385_v23 }
  0x4f   :  { %197 = vadd.xlane.f32.xlu1 %v196_v30  ;;  %194 = vadd.xlane.f32.xlu0 %v193_v31  ;;  %v232_v30 = vsel %vm78_vm0, %v2380_v22, 0.0  ;;  %v229_v31 = vsel %vm78_vm0, %v2385_v23, 0.0 }
  0x53   :  { %203 = vadd.xlane.f32.xlu1 %v202_v38  ;;  %200 = vadd.xlane.f32.xlu0 %v199_v39  ;;  %v2394_v38 = vld [vmem:[%s3755_s0 + $0x1a8] sm:$0xff]  ;;  %v2399_v39 = vld [vmem:[%s3755_s0 + $0x1a0] sm:$0xff] }
  0x54   :  { %3811 = vst [vmem:[#allocation4_spill] sm:$0xff] %v2394_v38  ;;  %3812 = vst [vmem:[#allocation5_spill] sm:$0xff] %v2399_v39 }
  0x57   :  { %209 = vadd.xlane.f32.xlu1 %v208_v46  ;;  %206 = vadd.xlane.f32.xlu0 %v205_v47  ;;  %v238_v46 = vsel %vm78_vm0, %v2394_v38, 0.0  ;;  %v235_v47 = vsel %vm78_vm0, %v2399_v39, 0.0 }
  0x5b   :  { %215 = vadd.xlane.f32.xlu1 %v214_v54  ;;  %212 = vadd.xlane.f32.xlu0 %v211_v55  ;;  %v2408_v54 = vld [vmem:[%s3755_s0 + $0x1b8] sm:$0xff]  ;;  %v2413_v55 = vld [vmem:[%s3755_s0 + $0x1b0] sm:$0xff] }
  0x5c   :  { %3813 = vst [vmem:[#allocation6_spill] sm:$0xff] %v2408_v54  ;;  %3814 = vst [vmem:[#allocation7_spill] sm:$0xff] %v2413_v55 }
  0x5f   :  { %221 = vadd.xlane.f32.xlu1 %v220_v62  ;;  %218 = vadd.xlane.f32.xlu0 %v217_v63  ;;  %v244_v62 = vsel %vm78_vm0, %v2408_v54, 0.0  ;;  %v241_v63 = vsel %vm78_vm0, %v2413_v55, 0.0 }
  0x63   :  { %227 = vadd.xlane.f32.xlu1 %v226_v14  ;;  %224 = vadd.xlane.f32.xlu0 %v223_v15  ;;  %v2422_v14 = vld [vmem:[%s3755_s0 + $0x1c8] sm:$0xff]  ;;  %v2427_v15 = vld [vmem:[%s3755_s0 + $0x1c0] sm:$0xff] }
  0x64   :  { %3815 = vst [vmem:[#allocation8_spill] sm:$0xff] %v2422_v14  ;;  %3816 = vst [vmem:[#allocation9_spill] sm:$0xff] %v2427_v15 }
  0x67   :  { %233 = vadd.xlane.f32.xlu1 %v232_v30  ;;  %230 = vadd.xlane.f32.xlu0 %v229_v31  ;;  %v250_v30 = vsel %vm78_vm0, %v2422_v14, 0.0  ;;  %v247_v31 = vsel %vm78_vm0, %v2427_v15, 0.0  ;;  %v2450_v15 = vld [vmem:[%s3755_s0 + $0x1e8] sm:$0xff]  ;;  %v2455_v14 = vld [vmem:[%s3755_s0 + $0x1e0] sm:$0xff] }
  0x68   :  { %3819 = vst [vmem:[#allocation12_spill] sm:$0xff] %v2450_v15  ;;  %3820 = vst [vmem:[#allocation13_spill] sm:$0xff] %v2455_v14 }
  0x6b   :  { %239 = vadd.xlane.f32.xlu1 %v238_v46  ;;  %236 = vadd.xlane.f32.xlu0 %v235_v47  ;;  %v2436_v46 = vld [vmem:[%s3755_s0 + $0x1d8] sm:$0xff]  ;;  %v2441_v47 = vld [vmem:[%s3755_s0 + $0x1d0] sm:$0xff] }
  0x6c   :  { %3817 = vst [vmem:[#allocation10_spill] sm:$0xff] %v2436_v46  ;;  %3818 = vst [vmem:[#allocation11_spill] sm:$0xff] %v2441_v47 }
  0x6f   :  { %245 = vadd.xlane.f32.xlu1 %v244_v62  ;;  %242 = vadd.xlane.f32.xlu0 %v241_v63  ;;  %v256_v62 = vsel %vm78_vm0, %v2436_v46, 0.0  ;;  %v253_v63 = vsel %vm78_vm0, %v2441_v47, 0.0  ;;  %v2464_v47 = vld [vmem:[%s3755_s0 + $0x1f8] sm:$0xff]  ;;  %v2469_v46 = vld [vmem:[%s3755_s0 + $0x1f0] sm:$0xff] }
  0x70   :  { %3821 = vst [vmem:[#allocation14_spill] sm:$0xff] %v2464_v47 }
  0x73   :  { %251 = vadd.xlane.f32.xlu1 %v250_v30  ;;  %248 = vadd.xlane.f32.xlu0 %v247_v31  ;;  %v262_v30 = vsel %vm78_vm0, %v2450_v15, 0.0  ;;  %v259_v31 = vsel %vm78_vm0, %v2455_v14, 0.0 }
  0x77   :  { %257 = vadd.xlane.f32.xlu1 %v256_v62  ;;  %254 = vadd.xlane.f32.xlu0 %v253_v63  ;;  %v268_v62 = vsel %vm78_vm0, %v2464_v47, 0.0  ;;  %v265_v63 = vsel %vm78_vm0, %v2469_v46, 0.0 }
  0x7b   :  { %263 = vadd.xlane.f32.xlu1 %v262_v30  ;;  %260 = vadd.xlane.f32.xlu0 %v259_v31 }
  0x7f   :  { %269 = vadd.xlane.f32.xlu1 %v268_v62  ;;  %266 = vadd.xlane.f32.xlu0 %v265_v63 }
  0x90   :  { %v81_v14 = vpop.xlane.xlu0 %80  ;;  %v87_v15 = vpop.xlane.xlu1 %86 }
  0x91   :  { %v271_v55 = vmul.f32 0.020408163, %v81_v14  ;;  %v273_v54 = vmul.f32 0.020408163, %v87_v15 }
  0x93   :  { %v2476_v39 = vsub.f32 %v2030_v0, %v271_v55  ;;  %v2479_v38 = vsub.f32 %v2035_v1, %v273_v54 }
  0x94   :  { %v84_v30 = vpop.xlane.xlu0 %83  ;;  %v90_v31 = vpop.xlane.xlu1 %89 }
  0x95   :  { %3822 = vst [vmem:[#allocation15_spill] sm:$0xff] %v2479_v38  ;;  %v272_v23 = vmul.f32 0.020408163, %v84_v30  ;;  %v274_v22 = vmul.f32 0.020408163, %v90_v31  ;;  %v399_v47 = vmul.f32 %v2476_v39, %v2476_v39  ;;  %v401_v62 = vmul.f32 %v2479_v38, %v2479_v38 }
  0x97   :  { %v2486_v63 = vsub.f32 %v2040_v2, %v272_v23  ;;  %v2489_v14 = vsub.f32 %v2049_v5, %v274_v22  ;;  %v463_v0 = vsel %vm78_vm0, %v399_v47, 0.0  ;;  %v469_v54 = vsel %vm78_vm0, %v401_v62, 0.0 }
  0x98   :  { %464 = vadd.xlane.f32.xlu0 %v463_v0  ;;  %v96_v1 = vpop.xlane.xlu1 %95  ;;  %v93_v55 = vpop.xlane.xlu0 %92 }
  0x99   :  { %v276_v15 = vmul.f32 0.020408163, %v96_v1  ;;  %v400_v30 = vmul.f32 %v2486_v63, %v2486_v63  ;;  %v402_v31 = vmul.f32 %v2489_v14, %v2489_v14  ;;  %v275_v38 = vmul.f32 0.020408163, %v93_v55 }
  0x9b   :  { %v2498_v2 = vsub.f32 %v2058_v8, %v276_v15  ;;  %v466_v5 = vsel %vm78_vm0, %v400_v30, 0.0  ;;  %v2502_v22 = vsub.f32 %v2063_v9, %v275_v38  ;;  %v472_v47 = vsel %vm78_vm0, %v402_v31, 0.0 }
  0x9c   :  { %467 = vadd.xlane.f32.xlu1 %v466_v5  ;;  %v102_v23 = vpop.xlane.xlu1 %101  ;;  %470 = vadd.xlane.f32.xlu0 %v469_v54  ;;  %v99_v62 = vpop.xlane.xlu0 %98 }
  0x9d   :  { %3823 = vst [vmem:[#allocation16_spill] sm:$0xff] %v2502_v22  ;;  %v278_v0 = vmul.f32 0.020408163, %v102_v23  ;;  %v404_v1 = vmul.f32 %v2498_v2, %v2498_v2  ;;  %v403_v55 = vmul.f32 %v2502_v22, %v2502_v22  ;;  %v277_v8 = vmul.f32 0.020408163, %v99_v62 }
  0x9f   :  { %v2510_v15 = vsub.f32 %v2072_v12, %v278_v0  ;;  %v475_v9 = vsel %vm78_vm0, %v403_v55, 0.0  ;;  %v2514_v38 = vsub.f32 %v2077_v13, %v277_v8  ;;  %v478_v30 = vsel %vm78_vm0, %v404_v1, 0.0 }
  0xa0   :  { %473 = vadd.xlane.f32.xlu1 %v472_v47  ;;  %v108_v54 = vpop.xlane.xlu1 %107  ;;  %476 = vadd.xlane.f32.xlu0 %v475_v9  ;;  %v105_v31 = vpop.xlane.xlu0 %104 }
  0xa1   :  { %v280_v5 = vmul.f32 0.020408163, %v108_v54  ;;  %v406_v23 = vmul.f32 %v2510_v15, %v2510_v15  ;;  %v279_v22 = vmul.f32 0.020408163, %v105_v31  ;;  %v405_v12 = vmul.f32 %v2514_v38, %v2514_v38 }
  0xa3   :  { %v2522_v62 = vsub.f32 %v2086_v16, %v280_v5  ;;  %v2525_v13 = vsub.f32 %v2091_v17, %v279_v22  ;;  %v481_v47 = vsel %vm78_vm0, %v405_v12, 0.0  ;;  %v484_v1 = vsel %vm78_vm0, %v406_v23, 0.0 }
  0xa4   :  { %479 = vadd.xlane.f32.xlu1 %v478_v30  ;;  %v114_v0 = vpop.xlane.xlu1 %113  ;;  %482 = vadd.xlane.f32.xlu0 %v481_v47  ;;  %v111_v55 = vpop.xlane.xlu0 %110 }
  0xa5   :  { %v282_v8 = vmul.f32 0.020408163, %v114_v0  ;;  %v408_v9 = vmul.f32 %v2522_v62, %v2522_v62  ;;  %v281_v54 = vmul.f32 0.020408163, %v111_v55  ;;  %v407_v16 = vmul.f32 %v2525_v13, %v2525_v13 }
  0xa7   :  { %v2534_v31 = vsub.f32 %v2100_v20, %v282_v8  ;;  %v2537_v17 = vsub.f32 %v2105_v21, %v281_v54  ;;  %v487_v22 = vsel %vm78_vm0, %v407_v16, 0.0  ;;  %v490_v5 = vsel %vm78_vm0, %v408_v9, 0.0 }
  0xa8   :  { %485 = vadd.xlane.f32.xlu1 %v484_v1  ;;  %v120_v30 = vpop.xlane.xlu1 %119  ;;  %488 = vadd.xlane.f32.xlu0 %v487_v22  ;;  %v117_v23 = vpop.xlane.xlu0 %116 }
  0xa9   :  { %v284_v12 = vmul.f32 0.020408163, %v120_v30  ;;  %v410_v47 = vmul.f32 %v2534_v31, %v2534_v31  ;;  %v283_v0 = vmul.f32 0.020408163, %v117_v23  ;;  %v409_v20 = vmul.f32 %v2537_v17, %v2537_v17 }
  0xab   :  { %v2546_v55 = vsub.f32 %v2114_v24, %v284_v12  ;;  %v2549_v21 = vsub.f32 %v2119_v25, %v283_v0  ;;  %v493_v1 = vsel %vm78_vm0, %v409_v20, 0.0  ;;  %v496_v9 = vsel %vm78_vm0, %v410_v47, 0.0 }
  0xac   :  { %491 = vadd.xlane.f32.xlu1 %v490_v5  ;;  %v126_v8 = vpop.xlane.xlu1 %125  ;;  %494 = vadd.xlane.f32.xlu0 %v493_v1  ;;  %v123_v54 = vpop.xlane.xlu0 %122 }
  0xad   :  { %v286_v16 = vmul.f32 0.020408163, %v126_v8  ;;  %v412_v22 = vmul.f32 %v2546_v55, %v2546_v55  ;;  %v285_v30 = vmul.f32 0.020408163, %v123_v54  ;;  %v411_v24 = vmul.f32 %v2549_v21, %v2549_v21 }
  0xaf   :  { %v2558_v23 = vsub.f32 %v2128_v28, %v286_v16  ;;  %v2561_v25 = vsub.f32 %v2133_v29, %v285_v30  ;;  %v499_v5 = vsel %vm78_vm0, %v411_v24, 0.0  ;;  %v502_v47 = vsel %vm78_vm0, %v412_v22, 0.0 }
  0xb0   :  { %497 = vadd.xlane.f32.xlu1 %v496_v9  ;;  %v132_v12 = vpop.xlane.xlu1 %131  ;;  %500 = vadd.xlane.f32.xlu0 %v499_v5  ;;  %v129_v0 = vpop.xlane.xlu0 %128 }
  0xb1   :  { %v288_v20 = vmul.f32 0.020408163, %v132_v12  ;;  %v414_v1 = vmul.f32 %v2558_v23, %v2558_v23  ;;  %v287_v8 = vmul.f32 0.020408163, %v129_v0  ;;  %v413_v28 = vmul.f32 %v2561_v25, %v2561_v25 }
  0xb3   :  { %v2570_v54 = vsub.f32 %v2142_v32, %v288_v20  ;;  %v2573_v29 = vsub.f32 %v2147_v33, %v287_v8  ;;  %v505_v9 = vsel %vm78_vm0, %v413_v28, 0.0  ;;  %v508_v22 = vsel %vm78_vm0, %v414_v1, 0.0 }
  0xb4   :  { %503 = vadd.xlane.f32.xlu1 %v502_v47  ;;  %v138_v16 = vpop.xlane.xlu1 %137  ;;  %506 = vadd.xlane.f32.xlu0 %v505_v9  ;;  %v135_v30 = vpop.xlane.xlu0 %134  ;;  %v2006_v20 = vmov 0  }
  0xb5   :  { %v290_v24 = vmul.f32 0.020408163, %v138_v16  ;;  %v416_v5 = vmul.f32 %v2570_v54, %v2570_v54  ;;  %v289_v12 = vmul.f32 0.020408163, %v135_v30  ;;  %v415_v32 = vmul.f32 %v2573_v29, %v2573_v29  ;;  %1876 = vset.pattern.permute.xlu0 %v2006_v20  ;;  %1877 = vset.pattern.permute.xlu1 %v2006_v20 }
  0xb7   :  { %v2582_v0 = vsub.f32 %v2156_v36, %v290_v24  ;;  %v2585_v33 = vsub.f32 %v2161_v37, %v289_v12  ;;  %v511_v47 = vsel %vm78_vm0, %v415_v32, 0.0  ;;  %v514_v8 = vsel %vm78_vm0, %v416_v5, 0.0 }
  0xb8   :  { %509 = vadd.xlane.f32.xlu1 %v508_v22  ;;  %v144_v1 = vpop.xlane.xlu1 %143  ;;  %512 = vadd.xlane.f32.xlu0 %v511_v47  ;;  %v141_v28 = vpop.xlane.xlu0 %140 }
  0xb9   :  { %v292_v9 = vmul.f32 0.020408163, %v144_v1  ;;  %v418_v16 = vmul.f32 %v2582_v0, %v2582_v0  ;;  %v291_v36 = vmul.f32 0.020408163, %v141_v28  ;;  %v417_v37 = vmul.f32 %v2585_v33, %v2585_v33 }
  0xbb   :  { %v2594_v30 = vsub.f32 %v2170_v40, %v292_v9  ;;  %v2597_v24 = vsub.f32 %v2175_v41, %v291_v36  ;;  %v517_v22 = vsel %vm78_vm0, %v417_v37, 0.0  ;;  %v520_v12 = vsel %vm78_vm0, %v418_v16, 0.0 }
  0xbc   :  { %515 = vadd.xlane.f32.xlu1 %v514_v8  ;;  %v150_v5 = vpop.xlane.xlu1 %149  ;;  %518 = vadd.xlane.f32.xlu0 %v517_v22  ;;  %v147_v32 = vpop.xlane.xlu0 %146 }
  0xbd   :  { %v294_v47 = vmul.f32 0.020408163, %v150_v5  ;;  %v420_v20 = vmul.f32 %v2594_v30, %v2594_v30  ;;  %v293_v1 = vmul.f32 0.020408163, %v147_v32  ;;  %v419_v40 = vmul.f32 %v2597_v24, %v2597_v24 }
  0xbf   :  { %v2606_v28 = vsub.f32 %v2184_v44, %v294_v47  ;;  %v2609_v41 = vsub.f32 %v2189_v45, %v293_v1  ;;  %v523_v8 = vsel %vm78_vm0, %v419_v40, 0.0  ;;  %v526_v16 = vsel %vm78_vm0, %v420_v20, 0.0 }
  0xc0   :  { %521 = vadd.xlane.f32.xlu1 %v520_v12  ;;  %v156_v9 = vpop.xlane.xlu1 %155  ;;  %524 = vadd.xlane.f32.xlu0 %v523_v8  ;;  %v153_v36 = vpop.xlane.xlu0 %152 }
  0xc1   :  { %v296_v37 = vmul.f32 0.020408163, %v156_v9  ;;  %v422_v22 = vmul.f32 %v2606_v28, %v2606_v28  ;;  %v295_v5 = vmul.f32 0.020408163, %v153_v36  ;;  %v421_v44 = vmul.f32 %v2609_v41, %v2609_v41 }
  0xc3   :  { %v2618_v32 = vsub.f32 %v2198_v48, %v296_v37  ;;  %v2621_v45 = vsub.f32 %v2203_v49, %v295_v5  ;;  %v529_v12 = vsel %vm78_vm0, %v421_v44, 0.0  ;;  %v532_v20 = vsel %vm78_vm0, %v422_v22, 0.0 }
  0xc4   :  { %527 = vadd.xlane.f32.xlu1 %v526_v16  ;;  %v162_v47 = vpop.xlane.xlu1 %161  ;;  %530 = vadd.xlane.f32.xlu0 %v529_v12  ;;  %v159_v1 = vpop.xlane.xlu0 %158 }
  0xc5   :  { %v298_v40 = vmul.f32 0.020408163, %v162_v47  ;;  %v424_v8 = vmul.f32 %v2618_v32, %v2618_v32  ;;  %v297_v9 = vmul.f32 0.020408163, %v159_v1  ;;  %v423_v48 = vmul.f32 %v2621_v45, %v2621_v45 }
  0xc7   :  { %v2630_v36 = vsub.f32 %v2212_v52, %v298_v40  ;;  %v2633_v49 = vsub.f32 %v2217_v53, %v297_v9  ;;  %v535_v16 = vsel %vm78_vm0, %v423_v48, 0.0  ;;  %v538_v22 = vsel %vm78_vm0, %v424_v8, 0.0 }
  0xc8   :  { %533 = vadd.xlane.f32.xlu1 %v532_v20  ;;  %v168_v37 = vpop.xlane.xlu1 %167  ;;  %536 = vadd.xlane.f32.xlu0 %v535_v16  ;;  %v165_v5 = vpop.xlane.xlu0 %164 }
  0xc9   :  { %3824 = vst [vmem:[#allocation17_spill] sm:$0xff] %v2633_v49  ;;  %v300_v44 = vmul.f32 0.020408163, %v168_v37  ;;  %v426_v12 = vmul.f32 %v2630_v36, %v2630_v36  ;;  %v299_v47 = vmul.f32 0.020408163, %v165_v5  ;;  %v425_v52 = vmul.f32 %v2633_v49, %v2633_v49 }
  0xcb   :  { %v2642_v1 = vsub.f32 %v2226_v56, %v300_v44  ;;  %v2645_v53 = vsub.f32 %v2231_v57, %v299_v47  ;;  %v541_v20 = vsel %vm78_vm0, %v425_v52, 0.0  ;;  %v544_v8 = vsel %vm78_vm0, %v426_v12, 0.0 }
  0xcc   :  { %539 = vadd.xlane.f32.xlu1 %v538_v22  ;;  %v174_v40 = vpop.xlane.xlu1 %173  ;;  %542 = vadd.xlane.f32.xlu0 %v541_v20  ;;  %v171_v9 = vpop.xlane.xlu0 %170 }
  0xcd   :  { %3825 = vst [vmem:[#allocation18_spill] sm:$0xff] %v2645_v53  ;;  %v302_v48 = vmul.f32 0.020408163, %v174_v40  ;;  %v428_v16 = vmul.f32 %v2642_v1, %v2642_v1  ;;  %v301_v37 = vmul.f32 0.020408163, %v171_v9  ;;  %v427_v56 = vmul.f32 %v2645_v53, %v2645_v53 }
  0xcf   :  { %v2654_v5 = vsub.f32 %v2240_v60, %v302_v48  ;;  %v2657_v57 = vsub.f32 %v2245_v61, %v301_v37  ;;  %v547_v22 = vsel %vm78_vm0, %v427_v56, 0.0  ;;  %v550_v12 = vsel %vm78_vm0, %v428_v16, 0.0 }
  0xd0   :  { %545 = vadd.xlane.f32.xlu1 %v544_v8  ;;  %v180_v44 = vpop.xlane.xlu1 %179  ;;  %548 = vadd.xlane.f32.xlu0 %v547_v22  ;;  %v177_v47 = vpop.xlane.xlu0 %176 }
  0xd1   :  { %3826 = vst [vmem:[#allocation19_spill] sm:$0xff] %v2657_v57  ;;  %v304_v52 = vmul.f32 0.020408163, %v180_v44  ;;  %v430_v20 = vmul.f32 %v2654_v5, %v2654_v5  ;;  %v303_v40 = vmul.f32 0.020408163, %v177_v47  ;;  %v429_v60 = vmul.f32 %v2657_v57, %v2657_v57 }
  0xd3   :  { %v2666_v9 = vsub.f32 %v2254_v3, %v304_v52  ;;  %v2669_v61 = vsub.f32 %v2259_v4, %v303_v40  ;;  %v553_v8 = vsel %vm78_vm0, %v429_v60, 0.0  ;;  %v556_v16 = vsel %vm78_vm0, %v430_v20, 0.0 }
  0xd4   :  { %551 = vadd.xlane.f32.xlu1 %v550_v12  ;;  %v186_v48 = vpop.xlane.xlu1 %185  ;;  %554 = vadd.xlane.f32.xlu0 %v553_v8  ;;  %v183_v37 = vpop.xlane.xlu0 %182 }
  0xd5   :  { %3827 = vst [vmem:[#allocation20_spill] sm:$0xff] %v2666_v9  ;;  %3828 = vst [vmem:[#allocation21_spill] sm:$0xff] %v2669_v61  ;;  %v306_v56 = vmul.f32 0.020408163, %v186_v48  ;;  %v432_v22 = vmul.f32 %v2666_v9, %v2666_v9  ;;  %v305_v44 = vmul.f32 0.020408163, %v183_v37  ;;  %v431_v3 = vmul.f32 %v2669_v61, %v2669_v61 }
  0xd6   :  { %v1394_v9 = vld [vmem:[%s3757_s2 + $0x118] sm:$0xff] }
  0xd7   :  { %v2678_v47 = vsub.f32 %v2268_v10, %v306_v56  ;;  %v2681_v4 = vsub.f32 %v2273_v11, %v305_v44  ;;  %v559_v12 = vsel %vm78_vm0, %v431_v3, 0.0  ;;  %v562_v20 = vsel %vm78_vm0, %v432_v22, 0.0 }
  0xd8   :  { %557 = vadd.xlane.f32.xlu1 %v556_v16  ;;  %v192_v52 = vpop.xlane.xlu1 %191  ;;  %560 = vadd.xlane.f32.xlu0 %v559_v12  ;;  %v189_v40 = vpop.xlane.xlu0 %188 }
  0xd9   :  { %3829 = vst [vmem:[#allocation22_spill] sm:$0xff] %v2678_v47  ;;  %3830 = vst [vmem:[#allocation23_spill] sm:$0xff] %v2681_v4  ;;  %v308_v60 = vmul.f32 0.020408163, %v192_v52  ;;  %v434_v8 = vmul.f32 %v2678_v47, %v2678_v47  ;;  %v307_v48 = vmul.f32 0.020408163, %v189_v40  ;;  %v433_v10 = vmul.f32 %v2681_v4, %v2681_v4 }
  0xda   :  { %v1392_v47 = vld [vmem:[%s3757_s2 + $0x108] sm:$0xff] }
  0xdb   :  { %v2690_v37 = vsub.f32 %v2282_v18, %v308_v60  ;;  %v2693_v11 = vsub.f32 %v2287_v19, %v307_v48  ;;  %v565_v16 = vsel %vm78_vm0, %v433_v10, 0.0  ;;  %v568_v22 = vsel %vm78_vm0, %v434_v8, 0.0 }
  0xdc   :  { %563 = vadd.xlane.f32.xlu1 %v562_v20  ;;  %v198_v56 = vpop.xlane.xlu1 %197  ;;  %566 = vadd.xlane.f32.xlu0 %v565_v16  ;;  %v195_v44 = vpop.xlane.xlu0 %194 }
  0xdd   :  { %3831 = vst [vmem:[#allocation24_spill] sm:$0xff] %v2690_v37  ;;  %3832 = vst [vmem:[#allocation25_spill] sm:$0xff] %v2693_v11  ;;  %v310_v3 = vmul.f32 0.020408163, %v198_v56  ;;  %v436_v12 = vmul.f32 %v2690_v37, %v2690_v37  ;;  %v309_v52 = vmul.f32 0.020408163, %v195_v44  ;;  %v435_v18 = vmul.f32 %v2693_v11, %v2693_v11 }
  0xde   :  { %v1390_v37 = vld [vmem:[%s3757_s2 + $0xf8] sm:$0xff] }
  0xdf   :  { %v2702_v40 = vsub.f32 %v2296_v26, %v310_v3  ;;  %v2705_v19 = vsub.f32 %v2301_v27, %v309_v52  ;;  %v571_v20 = vsel %vm78_vm0, %v435_v18, 0.0  ;;  %v574_v8 = vsel %vm78_vm0, %v436_v12, 0.0 }
  0xe0   :  { %569 = vadd.xlane.f32.xlu1 %v568_v22  ;;  %v204_v60 = vpop.xlane.xlu1 %203  ;;  %572 = vadd.xlane.f32.xlu0 %v571_v20  ;;  %v201_v48 = vpop.xlane.xlu0 %200 }
  0xe1   :  { %3833 = vst [vmem:[#allocation26_spill] sm:$0xff] %v2702_v40  ;;  %3834 = vst [vmem:[#allocation27_spill] sm:$0xff] %v2705_v19  ;;  %v312_v10 = vmul.f32 0.020408163, %v204_v60  ;;  %v438_v16 = vmul.f32 %v2702_v40, %v2702_v40  ;;  %v311_v56 = vmul.f32 0.020408163, %v201_v48  ;;  %v437_v26 = vmul.f32 %v2705_v19, %v2705_v19 }
  0xe2   :  { %v1388_v40 = vld [vmem:[%s3757_s2 + $0xe8] sm:$0xff] }
  0xe3   :  { %v2714_v44 = vsub.f32 %v2310_v34, %v312_v10  ;;  %v2717_v27 = vsub.f32 %v2315_v35, %v311_v56  ;;  %v577_v22 = vsel %vm78_vm0, %v437_v26, 0.0  ;;  %v580_v12 = vsel %vm78_vm0, %v438_v16, 0.0 }
  0xe4   :  { %575 = vadd.xlane.f32.xlu1 %v574_v8  ;;  %v210_v3 = vpop.xlane.xlu1 %209  ;;  %578 = vadd.xlane.f32.xlu0 %v577_v22  ;;  %v207_v52 = vpop.xlane.xlu0 %206 }
  0xe5   :  { %3835 = vst [vmem:[#allocation28_spill] sm:$0xff] %v2714_v44  ;;  %3836 = vst [vmem:[#allocation29_spill] sm:$0xff] %v2717_v27  ;;  %v314_v18 = vmul.f32 0.020408163, %v210_v3  ;;  %v440_v20 = vmul.f32 %v2714_v44, %v2714_v44  ;;  %v313_v60 = vmul.f32 0.020408163, %v207_v52  ;;  %v439_v34 = vmul.f32 %v2717_v27, %v2717_v27 }
  0xe6   :  { %v1386_v44 = vld [vmem:[%s3757_s2 + $0xd8] sm:$0xff] }
  0xe7   :  { %v2726_v48 = vsub.f32 %v2324_v42, %v314_v18  ;;  %v2729_v35 = vsub.f32 %v2329_v43, %v313_v60  ;;  %v583_v8 = vsel %vm78_vm0, %v439_v34, 0.0  ;;  %v586_v16 = vsel %vm78_vm0, %v440_v20, 0.0 }
  0xe8   :  { %581 = vadd.xlane.f32.xlu1 %v580_v12  ;;  %v216_v10 = vpop.xlane.xlu1 %215  ;;  %584 = vadd.xlane.f32.xlu0 %v583_v8  ;;  %v213_v56 = vpop.xlane.xlu0 %212 }
  0xe9   :  { %3837 = vst [vmem:[#allocation30_spill] sm:$0xff] %v2726_v48  ;;  %3838 = vst [vmem:[#allocation31_spill] sm:$0xff] %v2729_v35  ;;  %v316_v26 = vmul.f32 0.020408163, %v216_v10  ;;  %v442_v22 = vmul.f32 %v2726_v48, %v2726_v48  ;;  %v315_v3 = vmul.f32 0.020408163, %v213_v56  ;;  %v441_v42 = vmul.f32 %v2729_v35, %v2729_v35 }
  0xea   :  { %v1384_v48 = vld [vmem:[%s3757_s2 + $0xc8] sm:$0xff] }
  0xeb   :  { %v2738_v52 = vsub.f32 %v2338_v50, %v316_v26  ;;  %v2741_v43 = vsub.f32 %v2343_v51, %v315_v3  ;;  %v589_v12 = vsel %vm78_vm0, %v441_v42, 0.0  ;;  %v592_v20 = vsel %vm78_vm0, %v442_v22, 0.0 }
  0xec   :  { %587 = vadd.xlane.f32.xlu1 %v586_v16  ;;  %v222_v18 = vpop.xlane.xlu1 %221  ;;  %590 = vadd.xlane.f32.xlu0 %v589_v12  ;;  %v219_v60 = vpop.xlane.xlu0 %218 }
  0xed   :  { %3839 = vst [vmem:[#allocation32_spill] sm:$0xff] %v2738_v52  ;;  %3840 = vst [vmem:[#allocation33_spill] sm:$0xff] %v2741_v43  ;;  %v318_v34 = vmul.f32 0.020408163, %v222_v18  ;;  %v444_v8 = vmul.f32 %v2738_v52, %v2738_v52  ;;  %v317_v10 = vmul.f32 0.020408163, %v219_v60  ;;  %v443_v50 = vmul.f32 %v2741_v43, %v2741_v43 }
  0xee   :  { %v1382_v52 = vld [vmem:[%s3757_s2 + $0xb8] sm:$0xff] }
  0xef   :  { %v2750_v56 = vsub.f32 %v2352_v58, %v318_v34  ;;  %v2753_v51 = vsub.f32 %v2357_v59, %v317_v10  ;;  %v595_v16 = vsel %vm78_vm0, %v443_v50, 0.0  ;;  %v598_v22 = vsel %vm78_vm0, %v444_v8, 0.0 }
  0xf0   :  { %593 = vadd.xlane.f32.xlu1 %v592_v20  ;;  %v228_v26 = vpop.xlane.xlu1 %227  ;;  %596 = vadd.xlane.f32.xlu0 %v595_v16  ;;  %v225_v3 = vpop.xlane.xlu0 %224 }
  0xf1   :  { %3841 = vst [vmem:[#allocation34_spill] sm:$0xff] %v2750_v56  ;;  %3842 = vst [vmem:[#allocation35_spill] sm:$0xff] %v2753_v51  ;;  %v320_v42 = vmul.f32 0.020408163, %v228_v26  ;;  %v446_v12 = vmul.f32 %v2750_v56, %v2750_v56  ;;  %v319_v18 = vmul.f32 0.020408163, %v225_v3  ;;  %v445_v58 = vmul.f32 %v2753_v51, %v2753_v51 }
  0xf2   :  { %v3845_v3 = vld [vmem:[#allocation2_spill] sm:$0xff] }
  0xf3   :  { %v2762_v60 = vsub.f32 %v2366_v6, %v320_v42  ;;  %v2765_v59 = vsub.f32 %v2371_v7, %v319_v18  ;;  %v601_v20 = vsel %vm78_vm0, %v445_v58, 0.0  ;;  %v604_v8 = vsel %vm78_vm0, %v446_v12, 0.0  ;;  %v3847_v7 = vld [vmem:[#allocation3_spill] sm:$0xff] }
  0xf4   :  { %599 = vadd.xlane.f32.xlu1 %v598_v22  ;;  %v234_v34 = vpop.xlane.xlu1 %233  ;;  %602 = vadd.xlane.f32.xlu0 %v601_v20  ;;  %v231_v10 = vpop.xlane.xlu0 %230 }
  0xf5   :  { %3843 = vst [vmem:[#allocation36_spill] sm:$0xff] %v2762_v60  ;;  %3844 = vst [vmem:[#allocation37_spill] sm:$0xff] %v2765_v59  ;;  %v322_v50 = vmul.f32 0.020408163, %v234_v34  ;;  %v448_v16 = vmul.f32 %v2762_v60, %v2762_v60  ;;  %v321_v26 = vmul.f32 0.020408163, %v231_v10  ;;  %v447_v6 = vmul.f32 %v2765_v59, %v2765_v59 }
  0xf7   :  { %v2774_v42 = vsub.f32 %v3845_v3, %v322_v50  ;;  %v2777_v18 = vsub.f32 %v3847_v7, %v321_v26  ;;  %v607_v22 = vsel %vm78_vm0, %v447_v6, 0.0  ;;  %v610_v58 = vsel %vm78_vm0, %v448_v16, 0.0  ;;  %v3849_v3 = vld [vmem:[#allocation4_spill] sm:$0xff]  ;;  %v3851_v26 = vld [vmem:[#allocation5_spill] sm:$0xff] }
  0xf8   :  { %605 = vadd.xlane.f32.xlu1 %v604_v8  ;;  %v240_v12 = vpop.xlane.xlu1 %239  ;;  %608 = vadd.xlane.f32.xlu0 %v607_v22  ;;  %v237_v20 = vpop.xlane.xlu0 %236 }
  0xf9   :  { %3846 = vst [vmem:[#allocation2_spill] sm:$0xff] %v2774_v42  ;;  %3848 = vst [vmem:[#allocation3_spill] sm:$0xff] %v2777_v18  ;;  %v324_v34 = vmul.f32 0.020408163, %v240_v12  ;;  %v450_v10 = vmul.f32 %v2774_v42, %v2774_v42  ;;  %v323_v51 = vmul.f32 0.020408163, %v237_v20  ;;  %v449_v50 = vmul.f32 %v2777_v18, %v2777_v18 }
  0xfb   :  { %v2786_v59 = vsub.f32 %v3849_v3, %v324_v34  ;;  %v2789_v7 = vsub.f32 %v3851_v26, %v323_v51  ;;  %v613_v8 = vsel %vm78_vm0, %v449_v50, 0.0  ;;  %v616_v6 = vsel %vm78_vm0, %v450_v10, 0.0  ;;  %v3853_v3 = vld [vmem:[#allocation6_spill] sm:$0xff]  ;;  %v3855_v51 = vld [vmem:[#allocation7_spill] sm:$0xff] }
  0xfc   :  { %611 = vadd.xlane.f32.xlu1 %v610_v58  ;;  %v246_v16 = vpop.xlane.xlu1 %245  ;;  %614 = vadd.xlane.f32.xlu0 %v613_v8  ;;  %v243_v22 = vpop.xlane.xlu0 %242 }
  0xfd   :  { %3850 = vst [vmem:[#allocation4_spill] sm:$0xff] %v2786_v59  ;;  %3852 = vst [vmem:[#allocation5_spill] sm:$0xff] %v2789_v7  ;;  %v326_v12 = vmul.f32 0.020408163, %v246_v16  ;;  %v452_v20 = vmul.f32 %v2786_v59, %v2786_v59  ;;  %v325_v42 = vmul.f32 0.020408163, %v243_v22  ;;  %v451_v34 = vmul.f32 %v2789_v7, %v2789_v7 }
  0xff   :  { %v2798_v18 = vsub.f32 %v3853_v3, %v326_v12  ;;  %v2801_v26 = vsub.f32 %v3855_v51, %v325_v42  ;;  %v619_v58 = vsel %vm78_vm0, %v451_v34, 0.0  ;;  %v622_v50 = vsel %vm78_vm0, %v452_v20, 0.0  ;;  %v3857_v3 = vld [vmem:[#allocation8_spill] sm:$0xff]  ;;  %v3859_v42 = vld [vmem:[#allocation9_spill] sm:$0xff] }
 0x100   :  { %617 = vadd.xlane.f32.xlu1 %v616_v6  ;;  %v252_v10 = vpop.xlane.xlu1 %251  ;;  %620 = vadd.xlane.f32.xlu0 %v619_v58  ;;  %v249_v8 = vpop.xlane.xlu0 %248 }
 0x101   :  { %3854 = vst [vmem:[#allocation6_spill] sm:$0xff] %v2798_v18  ;;  %3856 = vst [vmem:[#allocation7_spill] sm:$0xff] %v2801_v26  ;;  %v328_v16 = vmul.f32 0.020408163, %v252_v10  ;;  %v454_v22 = vmul.f32 %v2798_v18, %v2798_v18  ;;  %v327_v59 = vmul.f32 0.020408163, %v249_v8  ;;  %v453_v12 = vmul.f32 %v2801_v26, %v2801_v26 }
 0x103   :  { %v2810_v7 = vsub.f32 %v3857_v3, %v328_v16  ;;  %v2813_v51 = vsub.f32 %v3859_v42, %v327_v59  ;;  %v625_v6 = vsel %vm78_vm0, %v453_v12, 0.0  ;;  %v628_v34 = vsel %vm78_vm0, %v454_v22, 0.0  ;;  %v3861_v3 = vld [vmem:[#allocation10_spill] sm:$0xff]  ;;  %v3863_v59 = vld [vmem:[#allocation11_spill] sm:$0xff] }
 0x104   :  { %623 = vadd.xlane.f32.xlu1 %v622_v50  ;;  %v258_v20 = vpop.xlane.xlu1 %257  ;;  %626 = vadd.xlane.f32.xlu0 %v625_v6  ;;  %v255_v58 = vpop.xlane.xlu0 %254 }
 0x105   :  { %3858 = vst [vmem:[#allocation8_spill] sm:$0xff] %v2810_v7  ;;  %3860 = vst [vmem:[#allocation9_spill] sm:$0xff] %v2813_v51  ;;  %v330_v10 = vmul.f32 0.020408163, %v258_v20  ;;  %v456_v8 = vmul.f32 %v2810_v7, %v2810_v7  ;;  %v329_v18 = vmul.f32 0.020408163, %v255_v58  ;;  %v455_v16 = vmul.f32 %v2813_v51, %v2813_v51 }
 0x107   :  { %v2822_v26 = vsub.f32 %v3861_v3, %v330_v10  ;;  %v2825_v42 = vsub.f32 %v3863_v59, %v329_v18  ;;  %v631_v50 = vsel %vm78_vm0, %v455_v16, 0.0  ;;  %v634_v12 = vsel %vm78_vm0, %v456_v8, 0.0  ;;  %v3865_v3 = vld [vmem:[#allocation12_spill] sm:$0xff]  ;;  %v3867_v18 = vld [vmem:[#allocation13_spill] sm:$0xff] }
 0x108   :  { %629 = vadd.xlane.f32.xlu1 %v628_v34  ;;  %v264_v22 = vpop.xlane.xlu1 %263  ;;  %632 = vadd.xlane.f32.xlu0 %v631_v50  ;;  %v261_v6 = vpop.xlane.xlu0 %260 }
 0x109   :  { %3862 = vst [vmem:[#allocation10_spill] sm:$0xff] %v2822_v26  ;;  %3864 = vst [vmem:[#allocation11_spill] sm:$0xff] %v2825_v42  ;;  %v332_v20 = vmul.f32 0.020408163, %v264_v22  ;;  %v458_v58 = vmul.f32 %v2822_v26, %v2822_v26  ;;  %v331_v7 = vmul.f32 0.020408163, %v261_v6  ;;  %v457_v10 = vmul.f32 %v2825_v42, %v2825_v42 }
 0x10b   :  { %v2834_v51 = vsub.f32 %v3865_v3, %v332_v20  ;;  %v2837_v59 = vsub.f32 %v3867_v18, %v331_v7  ;;  %v637_v34 = vsel %vm78_vm0, %v457_v10, 0.0  ;;  %v640_v16 = vsel %vm78_vm0, %v458_v58, 0.0  ;;  %v3869_v3 = vld [vmem:[#allocation14_spill] sm:$0xff] }
 0x10c   :  { %635 = vadd.xlane.f32.xlu1 %v634_v12  ;;  %v270_v8 = vpop.xlane.xlu1 %269  ;;  %638 = vadd.xlane.f32.xlu0 %v637_v34  ;;  %v267_v50 = vpop.xlane.xlu0 %266 }
 0x10d   :  { %3866 = vst [vmem:[#allocation12_spill] sm:$0xff] %v2834_v51  ;;  %3868 = vst [vmem:[#allocation13_spill] sm:$0xff] %v2837_v59  ;;  %v334_v22 = vmul.f32 0.020408163, %v270_v8  ;;  %v460_v6 = vmul.f32 %v2834_v51, %v2834_v51  ;;  %v333_v26 = vmul.f32 0.020408163, %v267_v50  ;;  %v459_v20 = vmul.f32 %v2837_v59, %v2837_v59 }
 0x10f   :  { %v2846_v42 = vsub.f32 %v3869_v3, %v334_v22  ;;  %v2849_v7 = vsub.f32 %v2469_v46, %v333_v26  ;;  %v643_v12 = vsel %vm78_vm0, %v459_v20, 0.0  ;;  %v646_v58 = vsel %vm78_vm0, %v460_v6, 0.0 }
 0x110   :  { %641 = vadd.xlane.f32.xlu1 %v640_v16  ;;  %644 = vadd.xlane.f32.xlu0 %v643_v12 }
 0x111   :  { %3870 = vst [vmem:[#allocation14_spill] sm:$0xff] %v2846_v42  ;;  %3871 = vst [vmem:[#allocation38_spill] sm:$0xff] %v2849_v7  ;;  %v462_v10 = vmul.f32 %v2846_v42, %v2846_v42  ;;  %v461_v18 = vmul.f32 %v2849_v7, %v2849_v7 }
 0x113   :  { %v649_v34 = vsel %vm78_vm0, %v461_v18, 0.0  ;;  %v652_v8 = vsel %vm78_vm0, %v462_v10, 0.0 }
 0x114   :  { %647 = vadd.xlane.f32.xlu1 %v646_v58  ;;  %650 = vadd.xlane.f32.xlu0 %v649_v34 }
 0x118   :  { %653 = vadd.xlane.f32.xlu1 %v652_v8 }
 0x125   :  { %v465_v46 = vpop.xlane.xlu0 %464 }
 0x126   :  { %v655_v26 = vmul.f32 0.020408163, %v465_v46 }
 0x128   :  { %v783_v50 = vadd.f32 1e-05, %v655_v26  ;;  %v719_v26 = vld [vmem:[%s3756_s1] sm:$0xff] }
 0x129   :  { %v468_v16 = vpop.xlane.xlu1 %467  ;;  %v471_v22 = vpop.xlane.xlu0 %470 }
 0x12a   :  { %1878 = vrsqrt.f32 %v783_v50  ;;  %v656_v6 = vmul.f32 0.020408163, %v468_v16  ;;  %v657_v20 = vmul.f32 0.020408163, %v471_v22 }
 0x12c   :  { %v784_v3 = vadd.f32 1e-05, %v656_v6  ;;  %v785_v12 = vadd.f32 1e-05, %v657_v20 }
 0x12d   :  { %v474_v59 = vpop.xlane.xlu1 %473  ;;  %v477_v42 = vpop.xlane.xlu0 %476 }
 0x12e   :  { %1880 = vrsqrt.f32 %v784_v3  ;;  %v658_v7 = vmul.f32 0.020408163, %v474_v59  ;;  %v659_v18 = vmul.f32 0.020408163, %v477_v42  ;;  %v720_v42 = vld [vmem:[%s3756_s1 + $0x8] sm:$0xff] }
 0x12f   :  { %1882 = vrsqrt.f32 %v785_v12 }
 0x130   :  { %v786_v58 = vadd.f32 1e-05, %v658_v7  ;;  %v787_v46 = vadd.f32 1e-05, %v659_v18  ;;  %v721_v7 = vld [vmem:[%s3756_s1 + $0x10] sm:$0xff] }
 0x131   :  { %v480_v34 = vpop.xlane.xlu1 %479  ;;  %v483_v10 = vpop.xlane.xlu0 %482 }
 0x132   :  { %1884 = vrsqrt.f32 %v786_v58  ;;  %v660_v8 = vmul.f32 0.020408163, %v480_v34  ;;  %v661_v6 = vmul.f32 0.020408163, %v483_v10 }
 0x133   :  { %1886 = vrsqrt.f32 %v787_v46 }
 0x134   :  { %v1879_v50 = vpop.eup %1878  ;;  %v788_v51 = vadd.f32 1e-05, %v660_v8  ;;  %v789_v34 = vadd.f32 1e-05, %v661_v6 }
 0x135   :  { %v486_v16 = vpop.xlane.xlu1 %485  ;;  %v911_v22 = vmul.f32 %v1879_v50, %v719_v26  ;;  %v489_v20 = vpop.xlane.xlu0 %488 }
 0x136   :  { %v662_v12 = vmul.f32 0.020408163, %v486_v16  ;;  %1888 = vrsqrt.f32 %v788_v51  ;;  %v663_v35 = vmul.f32 0.020408163, %v489_v20 }
 0x137   :  { %977 = vperm.xlu0 %1876, %v911_v22   ;;  %v722_v22 = vld [vmem:[%s3756_s1 + $0x18] sm:$0xff]  ;;  %1890 = vrsqrt.f32 %v789_v34 }
 0x138   :  { %v1881_v59 = vpop.eup %1880  ;;  %v790_v43 = vadd.f32 1e-05, %v662_v12 }
 0x139   :  { %v1883_v3 = vpop.eup %1882  ;;  %v492_v18 = vpop.xlane.xlu1 %491  ;;  %v912_v58 = vmul.f32 %v1881_v59, %v720_v42  ;;  %v723_v59 = vld [vmem:[%s3756_s1 + $0x20] sm:$0xff] }
 0x13a   :  { %v495_v26 = vpop.xlane.xlu0 %494  ;;  %v664_v10 = vmul.f32 0.020408163, %v492_v18  ;;  %v913_v8 = vmul.f32 %v1883_v3, %v721_v7  ;;  %v791_v3 = vadd.f32 1e-05, %v663_v35  ;;  %v728_v35 = vld [vmem:[%s3756_s1 + $0x48] sm:$0xff] }
 0x13b   :  { %982 = vperm.xlu1 %1877, %v912_v58   ;;  %v665_v18 = vmul.f32 0.020408163, %v495_v26 }
 0x13c   :  { %v1885_v46 = vpop.eup %1884  ;;  %v792_v50 = vadd.f32 1e-05, %v664_v10 }
 0x13d   :  { %v498_v60 = vpop.xlane.xlu1 %497  ;;  %v914_v6 = vmul.f32 %v1885_v46, %v722_v22  ;;  %v1887_v42 = vpop.eup %1886  ;;  %v793_v46 = vadd.f32 1e-05, %v665_v18 }
 0x13e   :  { %v501_v56 = vpop.xlane.xlu0 %500  ;;  %1892 = vrsqrt.f32 %v792_v50  ;;  %v666_v16 = vmul.f32 0.020408163, %v498_v60  ;;  %v915_v20 = vmul.f32 %v1887_v42, %v723_v59  ;;  %v724_v60 = vld [vmem:[%s3756_s1 + $0x28] sm:$0xff] }
 0x13f   :  { %987 = vperm.xlu1 %1877, %v913_v8   ;;  %1894 = vrsqrt.f32 %v790_v43  ;;  %v667_v50 = vmul.f32 0.020408163, %v501_v56 }
 0x140   :  { %v794_v51 = vadd.f32 1e-05, %v666_v16  ;;  %v1889_v34 = vpop.eup %1888 }
 0x141   :  { %v504_v7 = vpop.xlane.xlu1 %503  ;;  %v1891_v26 = vpop.eup %1890  ;;  %v916_v16 = vmul.f32 %v1889_v34, %v724_v60  ;;  %v795_v56 = vadd.f32 1e-05, %v667_v50 }
 0x142   :  { %v507_v58 = vpop.xlane.xlu0 %506  ;;  %1896 = vrsqrt.f32 %v794_v51  ;;  %v668_v12 = vmul.f32 0.020408163, %v504_v7  ;;  %v725_v51 = vld [vmem:[%s3756_s1 + $0x30] sm:$0xff] }
 0x143   :  { %992 = vperm.xlu1 %1877, %v914_v6   ;;  %1898 = vrsqrt.f32 %v791_v3  ;;  %v669_v3 = vmul.f32 0.020408163, %v507_v58  ;;  %v917_v34 = vmul.f32 %v1891_v26, %v725_v51 }
 0x144   :  { %v796_v10 = vadd.f32 1e-05, %v668_v12 }
 0x145   :  { %v510_v8 = vpop.xlane.xlu1 %509  ;;  %v797_v50 = vadd.f32 1e-05, %v669_v3 }
 0x146   :  { %v513_v22 = vpop.xlane.xlu0 %512  ;;  %1900 = vrsqrt.f32 %v796_v10  ;;  %v670_v43 = vmul.f32 0.020408163, %v510_v8  ;;  %v730_v10 = vld [vmem:[%s3756_s1 + $0x58] sm:$0xff] }
 0x147   :  { %997 = vperm.xlu1 %1877, %v915_v20   ;;  %1902 = vrsqrt.f32 %v793_v46  ;;  %v726_v46 = vld [vmem:[%s3756_s1 + $0x38] sm:$0xff] }
 0x148   :  { %v1893_v6 = vpop.eup %1892  ;;  %v798_v42 = vadd.f32 1e-05, %v670_v43 }
 0x149   :  { %v516_v59 = vpop.xlane.xlu1 %515  ;;  %v920_v7 = vmul.f32 %v1893_v6, %v728_v35  ;;  %v1895_v20 = vpop.eup %1894  ;;  %v671_v35 = vmul.f32 0.020408163, %v513_v22 }
 0x14a   :  { %v519_v18 = vpop.xlane.xlu0 %518  ;;  %1904 = vrsqrt.f32 %v798_v42  ;;  %v672_v12 = vmul.f32 0.020408163, %v516_v59  ;;  %v732_v59 = vld [vmem:[%s3756_s1 + $0x68] sm:$0xff]  ;;  %v918_v26 = vmul.f32 %v1895_v20, %v726_v46 }
 0x14b   :  { %1022 = vperm.xlu0 %1876, %v920_v7   ;;  %1002 = vperm.xlu1 %1877, %v916_v16   ;;  %1906 = vrsqrt.f32 %v795_v56  ;;  %v727_v56 = vld [vmem:[%s3756_s1 + $0x40] sm:$0xff]  ;;  %v799_v3 = vadd.f32 1e-05, %v671_v35 }
 0x14c   :  { %v1897_v60 = vpop.eup %1896  ;;  %v800_v8 = vadd.f32 1e-05, %v672_v12 }
 0x14d   :  { %v522_v43 = vpop.xlane.xlu1 %521  ;;  %v922_v58 = vmul.f32 %v1897_v60, %v730_v10  ;;  %v1899_v16 = vpop.eup %1898  ;;  %v673_v10 = vmul.f32 0.020408163, %v519_v18 }
 0x14e   :  { %v525_v6 = vpop.xlane.xlu0 %524  ;;  %1908 = vrsqrt.f32 %v800_v8  ;;  %v674_v42 = vmul.f32 0.020408163, %v522_v43  ;;  %v734_v43 = vld [vmem:[%s3756_s1 + $0x78] sm:$0xff]  ;;  %v919_v20 = vmul.f32 %v1899_v16, %v727_v56 }
 0x14f   :  { %1032 = vperm.xlu0 %1876, %v922_v58   ;;  %1007 = vperm.xlu1 %1877, %v917_v34   ;;  %1910 = vrsqrt.f32 %v797_v50  ;;  %v729_v50 = vld [vmem:[%s3756_s1 + $0x50] sm:$0xff]  ;;  %v801_v35 = vadd.f32 1e-05, %v673_v10 }
 0x150   :  { %v1901_v51 = vpop.eup %1900  ;;  %v802_v7 = vadd.f32 1e-05, %v674_v42 }
 0x151   :  { %v528_v12 = vpop.xlane.xlu1 %527  ;;  %v924_v22 = vmul.f32 %v1901_v51, %v732_v59  ;;  %v1903_v34 = vpop.eup %1902  ;;  %v675_v59 = vmul.f32 0.020408163, %v525_v6 }
 0x152   :  { %v531_v60 = vpop.xlane.xlu0 %530  ;;  %1912 = vrsqrt.f32 %v802_v7  ;;  %v676_v8 = vmul.f32 0.020408163, %v528_v12  ;;  %v736_v12 = vld [vmem:[%s3756_s1 + $0x88] sm:$0xff]  ;;  %v921_v16 = vmul.f32 %v1903_v34, %v729_v50 }
 0x153   :  { %1042 = vperm.xlu0 %1876, %v924_v22   ;;  %1012 = vperm.xlu1 %1877, %v918_v26   ;;  %1914 = vrsqrt.f32 %v799_v3  ;;  %v731_v3 = vld [vmem:[%s3756_s1 + $0x60] sm:$0xff]  ;;  %v803_v10 = vadd.f32 1e-05, %v675_v59 }
 0x154   :  { %v1905_v46 = vpop.eup %1904  ;;  %v804_v58 = vadd.f32 1e-05, %v676_v8 }
 0x155   :  { %v534_v42 = vpop.xlane.xlu1 %533  ;;  %v926_v18 = vmul.f32 %v1905_v46, %v734_v43  ;;  %v1907_v26 = vpop.eup %1906  ;;  %v677_v43 = vmul.f32 0.020408163, %v531_v60 }
 0x156   :  { %v537_v51 = vpop.xlane.xlu0 %536  ;;  %1916 = vrsqrt.f32 %v804_v58  ;;  %v678_v7 = vmul.f32 0.020408163, %v534_v42  ;;  %v738_v42 = vld [vmem:[%s3756_s1 + $0x98] sm:$0xff]  ;;  %v923_v34 = vmul.f32 %v1907_v26, %v731_v3 }
 0x157   :  { %1052 = vperm.xlu0 %1876, %v926_v18   ;;  %1017 = vperm.xlu1 %1877, %v919_v20   ;;  %1918 = vrsqrt.f32 %v801_v35  ;;  %v733_v35 = vld [vmem:[%s3756_s1 + $0x70] sm:$0xff]  ;;  %v805_v59 = vadd.f32 1e-05, %v677_v43 }
 0x158   :  { %v1909_v56 = vpop.eup %1908  ;;  %v806_v22 = vadd.f32 1e-05, %v678_v7 }
 0x159   :  { %v540_v8 = vpop.xlane.xlu1 %539  ;;  %v928_v6 = vmul.f32 %v1909_v56, %v736_v12  ;;  %v1911_v20 = vpop.eup %1910  ;;  %v679_v12 = vmul.f32 0.020408163, %v537_v51 }
 0x15a   :  { %v543_v46 = vpop.xlane.xlu0 %542  ;;  %1920 = vrsqrt.f32 %v806_v22  ;;  %v680_v58 = vmul.f32 0.020408163, %v540_v8  ;;  %v740_v8 = vld [vmem:[%s3756_s1 + $0xa8] sm:$0xff]  ;;  %v925_v26 = vmul.f32 %v1911_v20, %v733_v35 }
 0x15b   :  { %1062 = vperm.xlu0 %1876, %v928_v6   ;;  %1027 = vperm.xlu1 %1877, %v921_v16   ;;  %1922 = vrsqrt.f32 %v803_v10  ;;  %v735_v10 = vld [vmem:[%s3756_s1 + $0x80] sm:$0xff]  ;;  %v807_v43 = vadd.f32 1e-05, %v679_v12 }
 0x15c   :  { %v1913_v50 = vpop.eup %1912  ;;  %v808_v18 = vadd.f32 1e-05, %v680_v58 }
 0x15d   :  { %v546_v7 = vpop.xlane.xlu1 %545  ;;  %v930_v60 = vmul.f32 %v1913_v50, %v738_v42  ;;  %v1915_v16 = vpop.eup %1914  ;;  %v681_v42 = vmul.f32 0.020408163, %v543_v46 }
 0x15e   :  { %v549_v56 = vpop.xlane.xlu0 %548  ;;  %1924 = vrsqrt.f32 %v808_v18  ;;  %v682_v22 = vmul.f32 0.020408163, %v546_v7  ;;  %v742_v7 = vld [vmem:[%s3756_s1 + $0xb8] sm:$0xff]  ;;  %v927_v20 = vmul.f32 %v1915_v16, %v735_v10 }
 0x15f   :  { %1072 = vperm.xlu0 %1876, %v930_v60   ;;  %1037 = vperm.xlu1 %1877, %v923_v34   ;;  %1926 = vrsqrt.f32 %v805_v59  ;;  %v737_v59 = vld [vmem:[%s3756_s1 + $0x90] sm:$0xff]  ;;  %v809_v12 = vadd.f32 1e-05, %v681_v42 }
 0x160   :  { %v1917_v3 = vpop.eup %1916  ;;  %v810_v6 = vadd.f32 1e-05, %v682_v22 }
 0x161   :  { %v552_v58 = vpop.xlane.xlu1 %551  ;;  %v932_v51 = vmul.f32 %v1917_v3, %v740_v8  ;;  %v1919_v34 = vpop.eup %1918  ;;  %v683_v8 = vmul.f32 0.020408163, %v549_v56 }
 0x162   :  { %v555_v50 = vpop.xlane.xlu0 %554  ;;  %1928 = vrsqrt.f32 %v810_v6  ;;  %v684_v18 = vmul.f32 0.020408163, %v552_v58  ;;  %v744_v58 = vld [vmem:[%s3756_s1 + $0xc8] sm:$0xff]  ;;  %v929_v16 = vmul.f32 %v1919_v34, %v737_v59 }
 0x163   :  { %1082 = vperm.xlu0 %1876, %v932_v51   ;;  %1047 = vperm.xlu1 %1877, %v925_v26   ;;  %1930 = vrsqrt.f32 %v807_v43  ;;  %v739_v43 = vld [vmem:[%s3756_s1 + $0xa0] sm:$0xff]  ;;  %v811_v42 = vadd.f32 1e-05, %v683_v8 }
 0x164   :  { %v1921_v35 = vpop.eup %1920  ;;  %v812_v60 = vadd.f32 1e-05, %v684_v18 }
 0x165   :  { %v558_v22 = vpop.xlane.xlu1 %557  ;;  %v934_v46 = vmul.f32 %v1921_v35, %v742_v7  ;;  %v1923_v26 = vpop.eup %1922  ;;  %v685_v7 = vmul.f32 0.020408163, %v555_v50 }
 0x166   :  { %v561_v3 = vpop.xlane.xlu0 %560  ;;  %1932 = vrsqrt.f32 %v812_v60  ;;  %v686_v6 = vmul.f32 0.020408163, %v558_v22  ;;  %v746_v22 = vld [vmem:[%s3756_s1 + $0xd8] sm:$0xff]  ;;  %v931_v34 = vmul.f32 %v1923_v26, %v739_v43 }
 0x167   :  { %1092 = vperm.xlu0 %1876, %v934_v46   ;;  %1057 = vperm.xlu1 %1877, %v927_v20   ;;  %1934 = vrsqrt.f32 %v809_v12  ;;  %v741_v12 = vld [vmem:[%s3756_s1 + $0xb0] sm:$0xff]  ;;  %v813_v8 = vadd.f32 1e-05, %v685_v7 }
 0x168   :  { %v1925_v10 = vpop.eup %1924  ;;  %v814_v51 = vadd.f32 1e-05, %v686_v6 }
 0x169   :  { %v564_v18 = vpop.xlane.xlu1 %563  ;;  %v936_v56 = vmul.f32 %v1925_v10, %v744_v58  ;;  %v1927_v20 = vpop.eup %1926  ;;  %v687_v58 = vmul.f32 0.020408163, %v561_v3 }
 0x16a   :  { %v567_v35 = vpop.xlane.xlu0 %566  ;;  %1936 = vrsqrt.f32 %v814_v51  ;;  %v688_v60 = vmul.f32 0.020408163, %v564_v18  ;;  %v748_v18 = vld [vmem:[%s3756_s1 + $0xe8] sm:$0xff]  ;;  %v933_v26 = vmul.f32 %v1927_v20, %v741_v12 }
 0x16b   :  { %1102 = vperm.xlu0 %1876, %v936_v56   ;;  %1067 = vperm.xlu1 %1877, %v929_v16   ;;  %1938 = vrsqrt.f32 %v811_v42  ;;  %v743_v42 = vld [vmem:[%s3756_s1 + $0xc0] sm:$0xff]  ;;  %v815_v7 = vadd.f32 1e-05, %v687_v58 }
 0x16c   :  { %v1929_v59 = vpop.eup %1928  ;;  %v816_v46 = vadd.f32 1e-05, %v688_v60 }
 0x16d   :  { %v570_v6 = vpop.xlane.xlu1 %569  ;;  %v938_v50 = vmul.f32 %v1929_v59, %v746_v22  ;;  %v1931_v16 = vpop.eup %1930  ;;  %v689_v22 = vmul.f32 0.020408163, %v567_v35 }
 0x16e   :  { %v573_v10 = vpop.xlane.xlu0 %572  ;;  %1940 = vrsqrt.f32 %v816_v46  ;;  %v690_v51 = vmul.f32 0.020408163, %v570_v6  ;;  %v750_v6 = vld [vmem:[%s3756_s1 + $0xf8] sm:$0xff]  ;;  %v935_v20 = vmul.f32 %v1931_v16, %v743_v42 }
 0x16f   :  { %1112 = vperm.xlu0 %1876, %v938_v50   ;;  %1077 = vperm.xlu1 %1877, %v931_v34   ;;  %1942 = vrsqrt.f32 %v813_v8  ;;  %v745_v8 = vld [vmem:[%s3756_s1 + $0xd0] sm:$0xff]  ;;  %v817_v58 = vadd.f32 1e-05, %v689_v22 }
 0x170   :  { %v1933_v43 = vpop.eup %1932  ;;  %v818_v56 = vadd.f32 1e-05, %v690_v51 }
 0x171   :  { %v576_v60 = vpop.xlane.xlu1 %575  ;;  %v940_v3 = vmul.f32 %v1933_v43, %v748_v18  ;;  %v1935_v34 = vpop.eup %1934  ;;  %v691_v18 = vmul.f32 0.020408163, %v573_v10 }
 0x172   :  { %v579_v59 = vpop.xlane.xlu0 %578  ;;  %1944 = vrsqrt.f32 %v818_v56  ;;  %v692_v46 = vmul.f32 0.020408163, %v576_v60  ;;  %v752_v60 = vld [vmem:[%s3756_s1 + $0x108] sm:$0xff]  ;;  %v937_v16 = vmul.f32 %v1935_v34, %v745_v8 }
 0x173   :  { %1122 = vperm.xlu0 %1876, %v940_v3   ;;  %1087 = vperm.xlu1 %1877, %v933_v26   ;;  %1946 = vrsqrt.f32 %v815_v7  ;;  %v747_v7 = vld [vmem:[%s3756_s1 + $0xe0] sm:$0xff]  ;;  %v819_v22 = vadd.f32 1e-05, %v691_v18 }
 0x174   :  { %v1937_v12 = vpop.eup %1936  ;;  %v820_v50 = vadd.f32 1e-05, %v692_v46 }
 0x175   :  { %v582_v51 = vpop.xlane.xlu1 %581  ;;  %v942_v35 = vmul.f32 %v1937_v12, %v750_v6  ;;  %v1939_v26 = vpop.eup %1938  ;;  %v693_v6 = vmul.f32 0.020408163, %v579_v59 }
 0x176   :  { %v585_v43 = vpop.xlane.xlu0 %584  ;;  %1948 = vrsqrt.f32 %v820_v50  ;;  %v694_v56 = vmul.f32 0.020408163, %v582_v51  ;;  %v754_v51 = vld [vmem:[%s3756_s1 + $0x118] sm:$0xff]  ;;  %v939_v34 = vmul.f32 %v1939_v26, %v747_v7 }
 0x177   :  { %1132 = vperm.xlu0 %1876, %v942_v35   ;;  %1097 = vperm.xlu1 %1877, %v935_v20   ;;  %1950 = vrsqrt.f32 %v817_v58  ;;  %v749_v58 = vld [vmem:[%s3756_s1 + $0xf0] sm:$0xff]  ;;  %v821_v18 = vadd.f32 1e-05, %v693_v6 }
 0x178   :  { %v1941_v42 = vpop.eup %1940  ;;  %v822_v3 = vadd.f32 1e-05, %v694_v56 }
 0x179   :  { %v588_v46 = vpop.xlane.xlu1 %587  ;;  %v944_v10 = vmul.f32 %v1941_v42, %v752_v60  ;;  %v1943_v20 = vpop.eup %1942  ;;  %v695_v60 = vmul.f32 0.020408163, %v585_v43 }
 0x17a   :  { %v591_v12 = vpop.xlane.xlu0 %590  ;;  %1952 = vrsqrt.f32 %v822_v3  ;;  %v696_v50 = vmul.f32 0.020408163, %v588_v46  ;;  %v756_v46 = vld [vmem:[%s3756_s1 + $0x128] sm:$0xff]  ;;  %v941_v26 = vmul.f32 %v1943_v20, %v749_v58 }
 0x17b   :  { %1142 = vperm.xlu0 %1876, %v944_v10   ;;  %1107 = vperm.xlu1 %1877, %v937_v16   ;;  %1954 = vrsqrt.f32 %v819_v22  ;;  %v751_v22 = vld [vmem:[%s3756_s1 + $0x100] sm:$0xff]  ;;  %v823_v6 = vadd.f32 1e-05, %v695_v60 }
 0x17c   :  { %v1945_v8 = vpop.eup %1944  ;;  %v824_v35 = vadd.f32 1e-05, %v696_v50 }
 0x17d   :  { %v594_v56 = vpop.xlane.xlu1 %593  ;;  %v946_v59 = vmul.f32 %v1945_v8, %v754_v51  ;;  %v1947_v16 = vpop.eup %1946  ;;  %v697_v51 = vmul.f32 0.020408163, %v591_v12 }
 0x17e   :  { %v597_v42 = vpop.xlane.xlu0 %596  ;;  %1956 = vrsqrt.f32 %v824_v35  ;;  %v698_v3 = vmul.f32 0.020408163, %v594_v56  ;;  %v758_v56 = vld [vmem:[%s3756_s1 + $0x138] sm:$0xff]  ;;  %v943_v20 = vmul.f32 %v1947_v16, %v751_v22 }
 0x17f   :  { %1152 = vperm.xlu0 %1876, %v946_v59   ;;  %1117 = vperm.xlu1 %1877, %v939_v34   ;;  %1958 = vrsqrt.f32 %v821_v18  ;;  %v753_v18 = vld [vmem:[%s3756_s1 + $0x110] sm:$0xff]  ;;  %v825_v60 = vadd.f32 1e-05, %v697_v51 }
 0x180   :  { %v1949_v7 = vpop.eup %1948  ;;  %v826_v10 = vadd.f32 1e-05, %v698_v3 }
 0x181   :  { %v600_v50 = vpop.xlane.xlu1 %599  ;;  %v948_v43 = vmul.f32 %v1949_v7, %v756_v46  ;;  %v1951_v34 = vpop.eup %1950  ;;  %v699_v46 = vmul.f32 0.020408163, %v597_v42 }
 0x182   :  { %v603_v8 = vpop.xlane.xlu0 %602  ;;  %1960 = vrsqrt.f32 %v826_v10  ;;  %v700_v35 = vmul.f32 0.020408163, %v600_v50  ;;  %v760_v50 = vld [vmem:[%s3756_s1 + $0x148] sm:$0xff]  ;;  %v945_v16 = vmul.f32 %v1951_v34, %v753_v18 }
 0x183   :  { %1162 = vperm.xlu0 %1876, %v948_v43   ;;  %1127 = vperm.xlu1 %1877, %v941_v26   ;;  %1962 = vrsqrt.f32 %v823_v6  ;;  %v755_v6 = vld [vmem:[%s3756_s1 + $0x120] sm:$0xff]  ;;  %v827_v51 = vadd.f32 1e-05, %v699_v46 }
 0x184   :  { %v1953_v58 = vpop.eup %1952  ;;  %v828_v59 = vadd.f32 1e-05, %v700_v35 }
 0x185   :  { %v606_v3 = vpop.xlane.xlu1 %605  ;;  %v950_v12 = vmul.f32 %v1953_v58, %v758_v56  ;;  %v1955_v26 = vpop.eup %1954  ;;  %v701_v56 = vmul.f32 0.020408163, %v603_v8 }
 0x186   :  { %v609_v7 = vpop.xlane.xlu0 %608  ;;  %1964 = vrsqrt.f32 %v828_v59  ;;  %v702_v10 = vmul.f32 0.020408163, %v606_v3  ;;  %v762_v3 = vld [vmem:[%s3756_s1 + $0x158] sm:$0xff]  ;;  %v947_v34 = vmul.f32 %v1955_v26, %v755_v6 }
 0x187   :  { %1172 = vperm.xlu0 %1876, %v950_v12   ;;  %1137 = vperm.xlu1 %1877, %v943_v20   ;;  %1966 = vrsqrt.f32 %v825_v60  ;;  %v757_v60 = vld [vmem:[%s3756_s1 + $0x130] sm:$0xff]  ;;  %v829_v46 = vadd.f32 1e-05, %v701_v56 }
 0x188   :  { %v1957_v22 = vpop.eup %1956  ;;  %v830_v43 = vadd.f32 1e-05, %v702_v10 }
 0x189   :  { %v612_v35 = vpop.xlane.xlu1 %611  ;;  %v952_v42 = vmul.f32 %v1957_v22, %v760_v50  ;;  %v1959_v20 = vpop.eup %1958  ;;  %v703_v50 = vmul.f32 0.020408163, %v609_v7 }
 0x18a   :  { %v615_v58 = vpop.xlane.xlu0 %614  ;;  %1968 = vrsqrt.f32 %v830_v43  ;;  %v704_v59 = vmul.f32 0.020408163, %v612_v35  ;;  %v764_v35 = vld [vmem:[%s3756_s1 + $0x168] sm:$0xff]  ;;  %v949_v26 = vmul.f32 %v1959_v20, %v757_v60 }
 0x18b   :  { %1182 = vperm.xlu0 %1876, %v952_v42   ;;  %1147 = vperm.xlu1 %1877, %v945_v16   ;;  %1970 = vrsqrt.f32 %v827_v51  ;;  %v759_v51 = vld [vmem:[%s3756_s1 + $0x140] sm:$0xff]  ;;  %v831_v56 = vadd.f32 1e-05, %v703_v50 }
 0x18c   :  { %v1961_v18 = vpop.eup %1960  ;;  %v832_v12 = vadd.f32 1e-05, %v704_v59 }
 0x18d   :  { %v618_v10 = vpop.xlane.xlu1 %617  ;;  %v954_v8 = vmul.f32 %v1961_v18, %v762_v3  ;;  %v1963_v16 = vpop.eup %1962  ;;  %v705_v3 = vmul.f32 0.020408163, %v615_v58 }
 0x18e   :  { %v621_v22 = vpop.xlane.xlu0 %620  ;;  %1972 = vrsqrt.f32 %v832_v12  ;;  %v706_v43 = vmul.f32 0.020408163, %v618_v10  ;;  %v766_v10 = vld [vmem:[%s3756_s1 + $0x178] sm:$0xff]  ;;  %v951_v20 = vmul.f32 %v1963_v16, %v759_v51 }
 0x18f   :  { %1192 = vperm.xlu0 %1876, %v954_v8   ;;  %1157 = vperm.xlu1 %1877, %v947_v34   ;;  %1974 = vrsqrt.f32 %v829_v46  ;;  %v761_v46 = vld [vmem:[%s3756_s1 + $0x150] sm:$0xff]  ;;  %v833_v50 = vadd.f32 1e-05, %v705_v3 }
 0x190   :  { %v1965_v6 = vpop.eup %1964  ;;  %v834_v42 = vadd.f32 1e-05, %v706_v43 }
 0x191   :  { %v624_v59 = vpop.xlane.xlu1 %623  ;;  %v956_v7 = vmul.f32 %v1965_v6, %v764_v35  ;;  %v1967_v34 = vpop.eup %1966  ;;  %v707_v35 = vmul.f32 0.020408163, %v621_v22 }
 0x192   :  { %v627_v18 = vpop.xlane.xlu0 %626  ;;  %1976 = vrsqrt.f32 %v834_v42  ;;  %v708_v12 = vmul.f32 0.020408163, %v624_v59  ;;  %v768_v59 = vld [vmem:[%s3756_s1 + $0x188] sm:$0xff]  ;;  %v953_v16 = vmul.f32 %v1967_v34, %v761_v46 }
 0x193   :  { %1202 = vperm.xlu0 %1876, %v956_v7   ;;  %1167 = vperm.xlu1 %1877, %v949_v26   ;;  %1978 = vrsqrt.f32 %v831_v56  ;;  %v763_v56 = vld [vmem:[%s3756_s1 + $0x160] sm:$0xff]  ;;  %v835_v3 = vadd.f32 1e-05, %v707_v35 }
 0x194   :  { %v1969_v60 = vpop.eup %1968  ;;  %v836_v8 = vadd.f32 1e-05, %v708_v12 }
 0x195   :  { %v630_v43 = vpop.xlane.xlu1 %629  ;;  %v958_v58 = vmul.f32 %v1969_v60, %v766_v10  ;;  %v1971_v26 = vpop.eup %1970  ;;  %v709_v10 = vmul.f32 0.020408163, %v627_v18 }
 0x196   :  { %v633_v6 = vpop.xlane.xlu0 %632  ;;  %1980 = vrsqrt.f32 %v836_v8  ;;  %v710_v42 = vmul.f32 0.020408163, %v630_v43  ;;  %v770_v8 = vld [vmem:[%s3756_s1 + $0x198] sm:$0xff]  ;;  %v955_v34 = vmul.f32 %v1971_v26, %v763_v56 }
 0x197   :  { %1212 = vperm.xlu0 %1876, %v958_v58   ;;  %1177 = vperm.xlu1 %1877, %v951_v20   ;;  %1982 = vrsqrt.f32 %v833_v50  ;;  %v765_v50 = vld [vmem:[%s3756_s1 + $0x170] sm:$0xff]  ;;  %v837_v35 = vadd.f32 1e-05, %v709_v10 }
 0x198   :  { %v1973_v51 = vpop.eup %1972  ;;  %v838_v7 = vadd.f32 1e-05, %v710_v42 }
 0x199   :  { %v636_v12 = vpop.xlane.xlu1 %635  ;;  %v960_v22 = vmul.f32 %v1973_v51, %v768_v59  ;;  %v1975_v43 = vpop.eup %1974  ;;  %v711_v59 = vmul.f32 0.020408163, %v633_v6 }
 0x19a   :  { %1984 = vrsqrt.f32 %v838_v7  ;;  %v712_v60 = vmul.f32 0.020408163, %v636_v12  ;;  %v639_v20 = vpop.xlane.xlu0 %638  ;;  %v772_v7 = vld [vmem:[%s3756_s1 + $0x1a8] sm:$0xff]  ;;  %v957_v26 = vmul.f32 %v1975_v43, %v765_v50 }
 0x19b   :  { %1222 = vperm.xlu0 %1876, %v960_v22   ;;  %1187 = vperm.xlu1 %1877, %v953_v16   ;;  %1986 = vrsqrt.f32 %v835_v3  ;;  %v767_v22 = vld [vmem:[%s3756_s1 + $0x180] sm:$0xff]  ;;  %v839_v6 = vadd.f32 1e-05, %v711_v59 }
 0x19c   :  { %v1977_v46 = vpop.eup %1976  ;;  %v840_v58 = vadd.f32 1e-05, %v712_v60  ;;  %v713_v60 = vmul.f32 0.020408163, %v639_v20 }
 0x19d   :  { %v642_v42 = vpop.xlane.xlu1 %641  ;;  %v962_v18 = vmul.f32 %v1977_v46, %v770_v8  ;;  %v1979_v16 = vpop.eup %1978 }
 0x19e   :  { %1988 = vrsqrt.f32 %v840_v58  ;;  %v714_v51 = vmul.f32 0.020408163, %v642_v42  ;;  %v645_v8 = vpop.xlane.xlu0 %644  ;;  %v774_v58 = vld [vmem:[%s3756_s1 + $0x1b8] sm:$0xff]  ;;  %v959_v43 = vmul.f32 %v1979_v16, %v767_v22  ;;  %v841_v59 = vadd.f32 1e-05, %v713_v60 }
 0x19f   :  { %1232 = vperm.xlu0 %1876, %v962_v18   ;;  %1197 = vperm.xlu1 %1877, %v955_v34   ;;  %1990 = vrsqrt.f32 %v837_v35  ;;  %v769_v18 = vld [vmem:[%s3756_s1 + $0x190] sm:$0xff] }
 0x1a0   :  { %v1981_v56 = vpop.eup %1980  ;;  %v842_v12 = vadd.f32 1e-05, %v714_v51 }
 0x1a1   :  { %v648_v3 = vpop.xlane.xlu1 %647  ;;  %v964_v10 = vmul.f32 %v1981_v56, %v772_v7  ;;  %v1983_v34 = vpop.eup %1982  ;;  %v776_v7 = vld [vmem:[%s3756_s1 + $0x1c8] sm:$0xff]  ;;  %v715_v56 = vmul.f32 0.020408163, %v645_v8 }
 0x1a2   :  { %1992 = vrsqrt.f32 %v842_v12  ;;  %v716_v46 = vmul.f32 0.020408163, %v648_v3  ;;  %v961_v16 = vmul.f32 %v1983_v34, %v769_v18 }
 0x1a3   :  { %1242 = vperm.xlu0 %1876, %v964_v10   ;;  %1207 = vperm.xlu1 %1877, %v957_v26   ;;  %1994 = vrsqrt.f32 %v839_v6  ;;  %v651_v26 = vpop.xlane.xlu0 %650  ;;  %v771_v10 = vld [vmem:[%s3756_s1 + $0x1a0] sm:$0xff]  ;;  %v843_v60 = vadd.f32 1e-05, %v715_v56 }
 0x1a4   :  { %v1985_v50 = vpop.eup %1984  ;;  %v844_v42 = vadd.f32 1e-05, %v716_v46  ;;  %v778_v46 = vld [vmem:[%s3756_s1 + $0x1d8] sm:$0xff]  ;;  %v717_v8 = vmul.f32 0.020408163, %v651_v26 }
 0x1a5   :  { %v654_v35 = vpop.xlane.xlu1 %653  ;;  %v966_v20 = vmul.f32 %v1985_v50, %v774_v58  ;;  %v1987_v12 = vpop.eup %1986  ;;  %v773_v50 = vld [vmem:[%s3756_s1 + $0x1b0] sm:$0xff] }
 0x1a6   :  { %1996 = vrsqrt.f32 %v844_v42  ;;  %v718_v51 = vmul.f32 0.020408163, %v654_v35  ;;  %v963_v34 = vmul.f32 %v1987_v12, %v771_v10  ;;  %v845_v18 = vadd.f32 1e-05, %v717_v8  ;;  %v780_v35 = vld [vmem:[%s3756_s1 + $0x1e8] sm:$0xff]  ;;  %v782_v12 = vld [vmem:[%s3756_s1 + $0x1f8] sm:$0xff] }
 0x1a7   :  { %1252 = vperm.xlu0 %1876, %v966_v20   ;;  %1217 = vperm.xlu1 %1877, %v959_v43   ;;  %1998 = vrsqrt.f32 %v841_v59  ;;  %v779_v8 = vld [vmem:[%s3756_s1 + $0x1e0] sm:$0xff] }
 0x1a8   :  { %v1989_v22 = vpop.eup %1988  ;;  %v846_v3 = vadd.f32 1e-05, %v718_v51 }
 0x1a9   :  { %v968_v6 = vmul.f32 %v1989_v22, %v776_v7  ;;  %v1991_v58 = vpop.eup %1990  ;;  %v775_v7 = vld [vmem:[%s3756_s1 + $0x1c0] sm:$0xff] }
 0x1aa   :  { %2000 = vrsqrt.f32 %v846_v3  ;;  %v965_v59 = vmul.f32 %v1991_v58, %v773_v50  ;;  %v777_v3 = vld [vmem:[%s3756_s1 + $0x1d0] sm:$0xff]  ;;  %v1362_v50 = vld [vmem:[%s3757_s2 + $0x18] sm:$0xff] }
 0x1ab   :  { %1262 = vperm.xlu0 %1876, %v968_v6   ;;  %1227 = vperm.xlu1 %1877, %v961_v16   ;;  %2002 = vrsqrt.f32 %v843_v60 }
 0x1ac   :  { %v1993_v43 = vpop.eup %1992  ;;  %2004 = vrsqrt.f32 %v845_v18 }
 0x1ad   :  { %v970_v42 = vmul.f32 %v1993_v43, %v778_v46  ;;  %v1995_v20 = vpop.eup %1994  ;;  %v1360_v46 = vld [vmem:[%s3757_s2 + $0x8] sm:$0xff] }
 0x1ae   :  { %v967_v26 = vmul.f32 %v1995_v20, %v775_v7  ;;  %v1364_v20 = vld [vmem:[%s3757_s2 + $0x28] sm:$0xff]  ;;  %v1359_v7 = vld [vmem:[%s3757_s2] sm:$0xff] }
 0x1af   :  { %1272 = vperm.xlu0 %1876, %v970_v42   ;;  %1237 = vperm.xlu1 %1877, %v963_v34   ;;  %v781_v42 = vld [vmem:[%s3756_s1 + $0x1f0] sm:$0xff] }
 0x1b0   :  { %v1997_v51 = vpop.eup %1996 }
 0x1b1   :  { %v972_v56 = vmul.f32 %v1997_v51, %v780_v35  ;;  %v1999_v16 = vpop.eup %1998  ;;  %v1366_v51 = vld [vmem:[%s3757_s2 + $0x38] sm:$0xff] }
 0x1b2   :  { %v969_v6 = vmul.f32 %v1999_v16, %v777_v3  ;;  %v1368_v16 = vld [vmem:[%s3757_s2 + $0x48] sm:$0xff] }
 0x1b3   :  { %1282 = vperm.xlu0 %1876, %v972_v56   ;;  %1247 = vperm.xlu1 %1877, %v965_v59  }
 0x1b4   :  { %v2001_v22 = vpop.eup %2000 }
 0x1b5   :  { %v974_v10 = vmul.f32 %v2001_v22, %v782_v12  ;;  %v2003_v60 = vpop.eup %2002 }
 0x1b6   :  { %v971_v34 = vmul.f32 %v2003_v60, %v779_v8  ;;  %v2005_v43 = vpop.eup %2004  ;;  %v3072_v56 = vpop.permute.xlu0 %977  ;;  %v1372_v8 = vld [vmem:[%s3757_s2 + $0x68] sm:$0xff] }
 0x1b7   :  { %1292 = vperm.xlu0 %1876, %v974_v10   ;;  %1257 = vperm.xlu1 %1877, %v967_v26   ;;  %v973_v35 = vmul.f32 %v2005_v43, %v781_v42  ;;  %v1361_v26 = vld [vmem:[%s3757_s2 + $0x10] sm:$0xff]  ;;  %v1370_v10 = vld [vmem:[%s3757_s2 + $0x58] sm:$0xff] }
 0x1b8   :  { %v1374_v42 = vld [vmem:[%s3757_s2 + $0x78] sm:$0xff] }
 0x1ba   :  { %v3051_v58 = vpop.permute.xlu1 %982 }
 0x1bb   :  { %1430 = vperm.xlu0 %1876, %v1360_v46   ;;  %1267 = vperm.xlu1 %1877, %v969_v6   ;;  %v1363_v6 = vld [vmem:[%s3757_s2 + $0x20] sm:$0xff] }
 0x1be   :  { %v3059_v18 = vpop.permute.xlu1 %987 }
 0x1bf   :  { %1440 = vperm.xlu0 %1876, %v1362_v50   ;;  %1277 = vperm.xlu1 %1877, %v971_v34   ;;  %v1365_v34 = vld [vmem:[%s3757_s2 + $0x30] sm:$0xff] }
 0x1c2   :  { %v3064_v59 = vpop.permute.xlu1 %992 }
 0x1c3   :  { %1450 = vperm.xlu0 %1876, %v1364_v20   ;;  %1287 = vperm.xlu1 %1877, %v973_v35   ;;  %v1367_v35 = vld [vmem:[%s3757_s2 + $0x40] sm:$0xff] }
 0x1c6   :  { %v3074_v12 = vpop.permute.xlu1 %997 }
 0x1c7   :  { %1460 = vperm.xlu0 %1876, %v1366_v51   ;;  %1425 = vperm.xlu1 %1877, %v1359_v7   ;;  %v1376_v7 = vld [vmem:[%s3757_s2 + $0x88] sm:$0xff] }
 0x1ca   :  { %v3082_v22 = vpop.permute.xlu1 %1002  ;;  %v3084_v3 = vpop.permute.xlu0 %1022 }
 0x1cb   :  { %1470 = vperm.xlu0 %1876, %v1368_v16   ;;  %1435 = vperm.xlu1 %1877, %v1361_v26   ;;  %v1369_v16 = vld [vmem:[%s3757_s2 + $0x50] sm:$0xff] }
 0x1ce   :  { %v3092_v60 = vpop.permute.xlu1 %1007  ;;  %v3094_v46 = vpop.permute.xlu0 %1032 }
 0x1cf   :  { %1480 = vperm.xlu0 %1876, %v1370_v10   ;;  %1445 = vperm.xlu1 %1877, %v1363_v6   ;;  %v1378_v6 = vld [vmem:[%s3757_s2 + $0x98] sm:$0xff] }
 0x1d2   :  { %v3102_v43 = vpop.permute.xlu1 %1012  ;;  %v3104_v50 = vpop.permute.xlu0 %1042 }
 0x1d3   :  { %1490 = vperm.xlu0 %1876, %v1372_v8   ;;  %1455 = vperm.xlu1 %1877, %v1365_v34   ;;  %v1371_v8 = vld [vmem:[%s3757_s2 + $0x60] sm:$0xff] }
 0x1d6   :  { %v3112_v20 = vpop.permute.xlu1 %1017  ;;  %v3114_v51 = vpop.permute.xlu0 %1052 }
 0x1d7   :  { %1500 = vperm.xlu0 %1876, %v1374_v42   ;;  %1465 = vperm.xlu1 %1877, %v1367_v35   ;;  %v1380_v35 = vld [vmem:[%s3757_s2 + $0xa8] sm:$0xff] }
 0x1da   :  { %v3122_v26 = vpop.permute.xlu1 %1027  ;;  %v3124_v10 = vpop.permute.xlu0 %1062 }
 0x1db   :  { %1510 = vperm.xlu0 %1876, %v1376_v7   ;;  %1475 = vperm.xlu1 %1877, %v1369_v16   ;;  %v1373_v7 = vld [vmem:[%s3757_s2 + $0x70] sm:$0xff] }
 0x1de   :  { %v3132_v34 = vpop.permute.xlu1 %1037  ;;  %v3134_v42 = vpop.permute.xlu0 %1072 }
 0x1df   :  { %1520 = vperm.xlu0 %1876, %v1378_v6   ;;  %1485 = vperm.xlu1 %1877, %v1371_v8   ;;  %v1375_v6 = vld [vmem:[%s3757_s2 + $0x80] sm:$0xff] }
 0x1e2   :  { %v3142_v16 = vpop.permute.xlu1 %1047  ;;  %v3144_v27 = vpop.permute.xlu0 %1082 }
 0x1e3   :  { %1530 = vperm.xlu0 %1876, %v1380_v35   ;;  %1495 = vperm.xlu1 %1877, %v1373_v7   ;;  %v1377_v35 = vld [vmem:[%s3757_s2 + $0x90] sm:$0xff] }
 0x1e6   :  { %v3152_v8 = vpop.permute.xlu1 %1057  ;;  %v3154_v19 = vpop.permute.xlu0 %1092 }
 0x1e7   :  { %1540 = vperm.xlu0 %1876, %v1382_v52   ;;  %1505 = vperm.xlu1 %1877, %v1375_v6   ;;  %v1379_v52 = vld [vmem:[%s3757_s2 + $0xa0] sm:$0xff] }
 0x1ea   :  { %v3162_v7 = vpop.permute.xlu1 %1067  ;;  %v3164_v11 = vpop.permute.xlu0 %1102 }
 0x1eb   :  { %1550 = vperm.xlu0 %1876, %v1384_v48   ;;  %1515 = vperm.xlu1 %1877, %v1377_v35   ;;  %v1381_v48 = vld [vmem:[%s3757_s2 + $0xb0] sm:$0xff] }
 0x1ee   :  { %v3172_v6 = vpop.permute.xlu1 %1077  ;;  %v3174_v4 = vpop.permute.xlu0 %1112 }
 0x1ef   :  { %1560 = vperm.xlu0 %1876, %v1386_v44   ;;  %1525 = vperm.xlu1 %1877, %v1379_v52   ;;  %v1383_v44 = vld [vmem:[%s3757_s2 + $0xc0] sm:$0xff] }
 0x1f2   :  { %v3182_v35 = vpop.permute.xlu1 %1087  ;;  %v3184_v61 = vpop.permute.xlu0 %1122 }
 0x1f3   :  { %1570 = vperm.xlu0 %1876, %v1388_v40   ;;  %1535 = vperm.xlu1 %1877, %v1381_v48   ;;  %v1385_v40 = vld [vmem:[%s3757_s2 + $0xd0] sm:$0xff] }
 0x1f6   :  { %v3192_v52 = vpop.permute.xlu1 %1097  ;;  %v3194_v57 = vpop.permute.xlu0 %1132 }
 0x1f7   :  { %3872 = vst [vmem:[#allocation39_spill] sm:$0xff] %v3194_v57  ;;  %1580 = vperm.xlu0 %1876, %v1390_v37   ;;  %1545 = vperm.xlu1 %1877, %v1383_v44   ;;  %v1387_v37 = vld [vmem:[%s3757_s2 + $0xe0] sm:$0xff] }
 0x1fa   :  { %v3202_v48 = vpop.permute.xlu1 %1107  ;;  %v3204_v53 = vpop.permute.xlu0 %1142 }
 0x1fb   :  { %3873 = vst [vmem:[#allocation40_spill] sm:$0xff] %v3202_v48  ;;  %3874 = vst [vmem:[#allocation41_spill] sm:$0xff] %v3204_v53  ;;  %1590 = vperm.xlu0 %1876, %v1392_v47   ;;  %1555 = vperm.xlu1 %1877, %v1385_v40   ;;  %v1396_v53 = vld [vmem:[%s3757_s2 + $0x128] sm:$0xff]  ;;  %v1389_v47 = vld [vmem:[%s3757_s2 + $0xf0] sm:$0xff] }
 0x1fe   :  { %v3212_v44 = vpop.permute.xlu1 %1117  ;;  %v3214_v49 = vpop.permute.xlu0 %1152 }
 0x1ff   :  { %3875 = vst [vmem:[#allocation42_spill] sm:$0xff] %v3212_v44  ;;  %3876 = vst [vmem:[#allocation43_spill] sm:$0xff] %v3214_v49  ;;  %1600 = vperm.xlu0 %1876, %v1394_v9   ;;  %1565 = vperm.xlu1 %1877, %v1387_v37   ;;  %v1391_v49 = vld [vmem:[%s3757_s2 + $0x100] sm:$0xff]  ;;  %v1398_v9 = vld [vmem:[%s3757_s2 + $0x138] sm:$0xff] }
 0x202   :  { %v3222_v40 = vpop.permute.xlu1 %1127  ;;  %v3224_v48 = vpop.permute.xlu0 %1162 }
 0x203   :  { %3877 = vst [vmem:[#allocation44_spill] sm:$0xff] %v3222_v40  ;;  %3878 = vst [vmem:[#allocation45_spill] sm:$0xff] %v3224_v48  ;;  %1610 = vperm.xlu0 %1876, %v1396_v53   ;;  %1575 = vperm.xlu1 %1877, %v1389_v47   ;;  %v1393_v48 = vld [vmem:[%s3757_s2 + $0x110] sm:$0xff]  ;;  %v1400_v53 = vld [vmem:[%s3757_s2 + $0x148] sm:$0xff] }
 0x206   :  { %v3232_v37 = vpop.permute.xlu1 %1137  ;;  %v3234_v44 = vpop.permute.xlu0 %1172 }
 0x207   :  { %3879 = vst [vmem:[#allocation46_spill] sm:$0xff] %v3232_v37  ;;  %3880 = vst [vmem:[#allocation47_spill] sm:$0xff] %v3234_v44  ;;  %1585 = vperm.xlu1 %1877, %v1391_v49   ;;  %1620 = vperm.xlu0 %1876, %v1398_v9   ;;  %v1395_v44 = vld [vmem:[%s3757_s2 + $0x120] sm:$0xff]  ;;  %v1402_v49 = vld [vmem:[%s3757_s2 + $0x158] sm:$0xff] }
 0x20a   :  { %v3242_v47 = vpop.permute.xlu1 %1147  ;;  %v3244_v40 = vpop.permute.xlu0 %1182 }
 0x20b   :  { %3881 = vst [vmem:[#allocation48_spill] sm:$0xff] %v3242_v47  ;;  %3882 = vst [vmem:[#allocation49_spill] sm:$0xff] %v3244_v40  ;;  %1595 = vperm.xlu1 %1877, %v1393_v48   ;;  %1630 = vperm.xlu0 %1876, %v1400_v53   ;;  %v1397_v40 = vld [vmem:[%s3757_s2 + $0x130] sm:$0xff]  ;;  %v1404_v48 = vld [vmem:[%s3757_s2 + $0x168] sm:$0xff] }
 0x20e   :  { %v3252_v9 = vpop.permute.xlu1 %1157  ;;  %v3254_v37 = vpop.permute.xlu0 %1192 }
 0x20f   :  { %3883 = vst [vmem:[#allocation50_spill] sm:$0xff] %v3252_v9  ;;  %3884 = vst [vmem:[#allocation51_spill] sm:$0xff] %v3254_v37  ;;  %1605 = vperm.xlu1 %1877, %v1395_v44   ;;  %1640 = vperm.xlu0 %1876, %v1402_v49   ;;  %v1399_v37 = vld [vmem:[%s3757_s2 + $0x140] sm:$0xff]  ;;  %v1406_v44 = vld [vmem:[%s3757_s2 + $0x178] sm:$0xff] }
 0x212   :  { %v3262_v53 = vpop.permute.xlu1 %1167  ;;  %v3264_v47 = vpop.permute.xlu0 %1202 }
 0x213   :  { %3885 = vst [vmem:[#allocation52_spill] sm:$0xff] %v3262_v53  ;;  %3886 = vst [vmem:[#allocation53_spill] sm:$0xff] %v3264_v47  ;;  %1615 = vperm.xlu1 %1877, %v1397_v40   ;;  %1650 = vperm.xlu0 %1876, %v1404_v48   ;;  %v1401_v47 = vld [vmem:[%s3757_s2 + $0x150] sm:$0xff]  ;;  %v1408_v40 = vld [vmem:[%s3757_s2 + $0x188] sm:$0xff] }
 0x216   :  { %v3272_v49 = vpop.permute.xlu1 %1177  ;;  %v3274_v9 = vpop.permute.xlu0 %1212 }
 0x217   :  { %3887 = vst [vmem:[#allocation54_spill] sm:$0xff] %v3272_v49  ;;  %3888 = vst [vmem:[#allocation55_spill] sm:$0xff] %v3274_v9  ;;  %1625 = vperm.xlu1 %1877, %v1399_v37   ;;  %1660 = vperm.xlu0 %1876, %v1406_v44   ;;  %v1403_v9 = vld [vmem:[%s3757_s2 + $0x160] sm:$0xff]  ;;  %v1410_v37 = vld [vmem:[%s3757_s2 + $0x198] sm:$0xff] }
 0x21a   :  { %v3282_v48 = vpop.permute.xlu1 %1187  ;;  %v3284_v53 = vpop.permute.xlu0 %1222 }
 0x21b   :  { %3889 = vst [vmem:[#allocation56_spill] sm:$0xff] %v3282_v48  ;;  %3890 = vst [vmem:[#allocation57_spill] sm:$0xff] %v3284_v53  ;;  %1635 = vperm.xlu1 %1877, %v1401_v47   ;;  %1670 = vperm.xlu0 %1876, %v1408_v40   ;;  %v1405_v53 = vld [vmem:[%s3757_s2 + $0x170] sm:$0xff]  ;;  %v1412_v47 = vld [vmem:[%s3757_s2 + $0x1a8] sm:$0xff] }
 0x21e   :  { %v3292_v44 = vpop.permute.xlu1 %1197  ;;  %v3294_v49 = vpop.permute.xlu0 %1232 }
 0x21f   :  { %3891 = vst [vmem:[#allocation58_spill] sm:$0xff] %v3292_v44  ;;  %3892 = vst [vmem:[#allocation59_spill] sm:$0xff] %v3294_v49  ;;  %1645 = vperm.xlu1 %1877, %v1403_v9   ;;  %1680 = vperm.xlu0 %1876, %v1410_v37   ;;  %v1407_v49 = vld [vmem:[%s3757_s2 + $0x180] sm:$0xff]  ;;  %v1414_v9 = vld [vmem:[%s3757_s2 + $0x1b8] sm:$0xff] }
 0x222   :  { %v3302_v40 = vpop.permute.xlu1 %1207  ;;  %v3304_v48 = vpop.permute.xlu0 %1242 }
 0x223   :  { %3893 = vst [vmem:[#allocation60_spill] sm:$0xff] %v3302_v40  ;;  %3894 = vst [vmem:[#allocation61_spill] sm:$0xff] %v3304_v48  ;;  %1655 = vperm.xlu1 %1877, %v1405_v53   ;;  %1690 = vperm.xlu0 %1876, %v1412_v47   ;;  %v1409_v48 = vld [vmem:[%s3757_s2 + $0x190] sm:$0xff]  ;;  %v1416_v53 = vld [vmem:[%s3757_s2 + $0x1c8] sm:$0xff] }
 0x226   :  { %v3312_v37 = vpop.permute.xlu1 %1217  ;;  %v3314_v44 = vpop.permute.xlu0 %1252 }
 0x227   :  { %3895 = vst [vmem:[#allocation62_spill] sm:$0xff] %v3312_v37  ;;  %3896 = vst [vmem:[#allocation63_spill] sm:$0xff] %v3314_v44  ;;  %1665 = vperm.xlu1 %1877, %v1407_v49   ;;  %1700 = vperm.xlu0 %1876, %v1414_v9   ;;  %v1411_v44 = vld [vmem:[%s3757_s2 + $0x1a0] sm:$0xff]  ;;  %v1418_v49 = vld [vmem:[%s3757_s2 + $0x1d8] sm:$0xff] }
 0x22a   :  { %v3322_v47 = vpop.permute.xlu1 %1227  ;;  %v3324_v40 = vpop.permute.xlu0 %1262 }
 0x22b   :  { %3897 = vst [vmem:[#allocation64_spill] sm:$0xff] %v3322_v47  ;;  %3898 = vst [vmem:[#allocation65_spill] sm:$0xff] %v3324_v40  ;;  %1675 = vperm.xlu1 %1877, %v1409_v48   ;;  %1710 = vperm.xlu0 %1876, %v1416_v53   ;;  %v1413_v40 = vld [vmem:[%s3757_s2 + $0x1b0] sm:$0xff]  ;;  %v1420_v48 = vld [vmem:[%s3757_s2 + $0x1e8] sm:$0xff] }
 0x22e   :  { %v3332_v9 = vpop.permute.xlu1 %1237  ;;  %v3334_v37 = vpop.permute.xlu0 %1272 }
 0x22f   :  { %3899 = vst [vmem:[#allocation66_spill] sm:$0xff] %v3332_v9  ;;  %3900 = vst [vmem:[#allocation67_spill] sm:$0xff] %v3334_v37  ;;  %1685 = vperm.xlu1 %1877, %v1411_v44   ;;  %1720 = vperm.xlu0 %1876, %v1418_v49   ;;  %v1415_v37 = vld [vmem:[%s3757_s2 + $0x1c0] sm:$0xff]  ;;  %v1422_v44 = vld [vmem:[%s3757_s2 + $0x1f8] sm:$0xff] }
 0x232   :  { %v3342_v53 = vpop.permute.xlu1 %1247  ;;  %v3344_v47 = vpop.permute.xlu0 %1282 }
 0x233   :  { %3901 = vst [vmem:[#allocation68_spill] sm:$0xff] %v3342_v53  ;;  %3902 = vst [vmem:[#allocation69_spill] sm:$0xff] %v3344_v47  ;;  %1695 = vperm.xlu1 %1877, %v1413_v40   ;;  %1730 = vperm.xlu0 %1876, %v1420_v48   ;;  %v1417_v47 = vld [vmem:[%s3757_s2 + $0x1d0] sm:$0xff]  ;;  %v1296_v40 = vmul.f32 %v3051_v58, %v2486_v63 }
 0x236   :  { %v3352_v49 = vpop.permute.xlu1 %1257  ;;  %v3354_v9 = vpop.permute.xlu0 %1292 }
 0x237   :  { %3903 = vst [vmem:[#allocation70_spill] sm:$0xff] %v3352_v49  ;;  %1705 = vperm.xlu1 %1877, %v1415_v37   ;;  %1740 = vperm.xlu0 %1876, %v1422_v44   ;;  %v1419_v49 = vld [vmem:[%s3757_s2 + $0x1e0] sm:$0xff]  ;;  %v1298_v37 = vmul.f32 %v3064_v59, %v2489_v14 }
 0x23a   :  { %v3361_v48 = vpop.permute.xlu1 %1267  ;;  %v1431_v53 = vpop.permute.xlu0 %1430 }
 0x23b   :  { %v1744_v57 = vadd.f32 %v1431_v53, %v1296_v40  ;;  %1715 = vperm.xlu1 %1877, %v1417_v47   ;;  %v1421_v47 = vld [vmem:[%s3757_s2 + $0x1f0] sm:$0xff]  ;;  %v1300_v53 = vmul.f32 %v3082_v22, %v2498_v2  ;;  %v1302_v40 = vmul.f32 %v3102_v43, %v2510_v15 }
 0x23d   :  { %1808 = vst.msk [vmem:[%s3758_s3 + $0x8] sm:$0xff] %vm78_vm0, %v1744_v57 }
 0x23e   :  { %v3372_v44 = vpop.permute.xlu1 %1277  ;;  %v1441_v63 = vpop.permute.xlu0 %1440 }
 0x23f   :  { %v1746_v58 = vadd.f32 %v1441_v63, %v1298_v37  ;;  %1725 = vperm.xlu1 %1877, %v1419_v49   ;;  %v1295_v49 = vmul.f32 %v3072_v56, %v2476_v39 }
 0x241   :  { %1810 = vst.msk [vmem:[%s3758_s3 + $0x18] sm:$0xff] %vm78_vm0, %v1746_v58  ;;  %v3905_v58 = vld [vmem:[#allocation15_spill] sm:$0xff] }
 0x242   :  { %v3383_v14 = vpop.permute.xlu1 %1287  ;;  %v1451_v57 = vpop.permute.xlu0 %1450 }
 0x243   :  { %3904 = vst [vmem:[#allocation71_spill] sm:$0xff] %v3383_v14  ;;  %v1748_v59 = vadd.f32 %v1451_v57, %v1300_v53  ;;  %1735 = vperm.xlu1 %1877, %v1421_v47   ;;  %v1297_v14 = vmul.f32 %v3059_v18, %v3905_v58  ;;  %v1304_v47 = vmul.f32 %v3084_v3, %v2522_v62  ;;  %v3906_v53 = vld [vmem:[#allocation16_spill] sm:$0xff] }
 0x244   :  { %v1299_v18 = vmul.f32 %v3074_v12, %v3906_v53  ;;  %v1306_v62 = vmul.f32 %v3094_v46, %v2534_v31  ;;  %v1301_v12 = vmul.f32 %v3092_v60, %v2514_v38  ;;  %v1308_v31 = vmul.f32 %v3104_v50, %v2546_v55 }
 0x245   :  { %1812 = vst.msk [vmem:[%s3758_s3 + $0x28] sm:$0xff] %vm78_vm0, %v1748_v59  ;;  %v1303_v38 = vmul.f32 %v3112_v20, %v2525_v13  ;;  %v1310_v55 = vmul.f32 %v3114_v51, %v2558_v23  ;;  %v1305_v13 = vmul.f32 %v3122_v26, %v2537_v17  ;;  %v1312_v23 = vmul.f32 %v3124_v10, %v2570_v54 }
 0x246   :  { %v1426_v2 = vpop.permute.xlu1 %1425  ;;  %v1461_v22 = vpop.permute.xlu0 %1460  ;;  %v1307_v17 = vmul.f32 %v3132_v34, %v2549_v21  ;;  %v1314_v54 = vmul.f32 %v3134_v42, %v2582_v0  ;;  %v1309_v21 = vmul.f32 %v3142_v16, %v2561_v25  ;;  %v1316_v0 = vmul.f32 %v3144_v27, %v2594_v30 }
 0x247   :  { %v1743_v37 = vadd.f32 %v1426_v2, %v1295_v49  ;;  %v1750_v63 = vadd.f32 %v1461_v22, %v1302_v40  ;;  %v1311_v25 = vmul.f32 %v3152_v8, %v2573_v29  ;;  %v1318_v30 = vmul.f32 %v3154_v19, %v2606_v28 }
 0x248   :  { %v1313_v29 = vmul.f32 %v3162_v7, %v2585_v33  ;;  %v1320_v28 = vmul.f32 %v3164_v11, %v2618_v32  ;;  %v1315_v33 = vmul.f32 %v3172_v6, %v2597_v24  ;;  %v1322_v32 = vmul.f32 %v3174_v4, %v2630_v36 }
 0x249   :  { %1807 = vst.msk [vmem:[%s3758_s3] sm:$0xff] %vm78_vm0, %v1743_v37  ;;  %1814 = vst.msk [vmem:[%s3758_s3 + $0x38] sm:$0xff] %vm78_vm0, %v1750_v63  ;;  %v1317_v24 = vmul.f32 %v3182_v35, %v2609_v41  ;;  %v1324_v36 = vmul.f32 %v3184_v61, %v2642_v1  ;;  %v1319_v41 = vmul.f32 %v3192_v52, %v2621_v45  ;;  %v3907_v35 = vld [vmem:[#allocation39_spill] sm:$0xff]  ;;  %v3910_v52 = vld [vmem:[#allocation20_spill] sm:$0xff] }
 0x24a   :  { %v1436_v39 = vpop.permute.xlu1 %1435  ;;  %v1471_v15 = vpop.permute.xlu0 %1470  ;;  %v1326_v1 = vmul.f32 %v3907_v35, %v2654_v5 }
 0x24b   :  { %v1745_v56 = vadd.f32 %v1436_v39, %v1297_v14  ;;  %v1752_v43 = vadd.f32 %v1471_v15, %v1304_v47 }
 0x24d   :  { %1809 = vst.msk [vmem:[%s3758_s3 + $0x10] sm:$0xff] %vm78_vm0, %v1745_v56  ;;  %1816 = vst.msk [vmem:[%s3758_s3 + $0x48] sm:$0xff] %vm78_vm0, %v1752_v43 }
 0x24e   :  { %v1446_v3 = vpop.permute.xlu1 %1445  ;;  %v1481_v57 = vpop.permute.xlu0 %1480 }
 0x24f   :  { %v1747_v14 = vadd.f32 %v1446_v3, %v1299_v18  ;;  %v1754_v59 = vadd.f32 %v1481_v57, %v1306_v62 }
 0x251   :  { %1811 = vst.msk [vmem:[%s3758_s3 + $0x20] sm:$0xff] %vm78_vm0, %v1747_v14  ;;  %1818 = vst.msk [vmem:[%s3758_s3 + $0x58] sm:$0xff] %vm78_vm0, %v1754_v59 }
 0x252   :  { %v1456_v46 = vpop.permute.xlu1 %1455  ;;  %v1491_v49 = vpop.permute.xlu0 %1490 }
 0x253   :  { %v1749_v40 = vadd.f32 %v1456_v46, %v1301_v12  ;;  %v1756_v2 = vadd.f32 %v1491_v49, %v1308_v31  ;;  %v3908_v49 = vld [vmem:[#allocation17_spill] sm:$0xff] }
 0x255   :  { %1813 = vst.msk [vmem:[%s3758_s3 + $0x30] sm:$0xff] %vm78_vm0, %v1749_v40  ;;  %1820 = vst.msk [vmem:[%s3758_s3 + $0x68] sm:$0xff] %vm78_vm0, %v1756_v2  ;;  %v3909_v40 = vld [vmem:[#allocation40_spill] sm:$0xff]  ;;  %v3911_v2 = vld [vmem:[#allocation41_spill] sm:$0xff] }
 0x256   :  { %v1466_v60 = vpop.permute.xlu1 %1465  ;;  %v1501_v50 = vpop.permute.xlu0 %1500  ;;  %v1321_v45 = vmul.f32 %v3909_v40, %v3908_v49  ;;  %v1328_v5 = vmul.f32 %v3911_v2, %v3910_v52  ;;  %v3933_v49 = vld [vmem:[#allocation52_spill] sm:$0xff]  ;;  %v3935_v52 = vld [vmem:[#allocation53_spill] sm:$0xff] }
 0x257   :  { %v1751_v22 = vadd.f32 %v1466_v60, %v1303_v38  ;;  %v1758_v37 = vadd.f32 %v1501_v50, %v1310_v55 }
 0x259   :  { %1815 = vst.msk [vmem:[%s3758_s3 + $0x40] sm:$0xff] %vm78_vm0, %v1751_v22  ;;  %1822 = vst.msk [vmem:[%s3758_s3 + $0x78] sm:$0xff] %vm78_vm0, %v1758_v37  ;;  %v3912_v22 = vld [vmem:[#allocation18_spill] sm:$0xff] }
 0x25a   :  { %v1476_v20 = vpop.permute.xlu1 %1475  ;;  %v1511_v51 = vpop.permute.xlu0 %1510  ;;  %v3913_v37 = vld [vmem:[#allocation42_spill] sm:$0xff] }
 0x25b   :  { %v1753_v63 = vadd.f32 %v1476_v20, %v1305_v13  ;;  %v1760_v58 = vadd.f32 %v1511_v51, %v1312_v23  ;;  %v1323_v13 = vmul.f32 %v3913_v37, %v3912_v22  ;;  %v3914_v23 = vld [vmem:[#allocation22_spill] sm:$0xff]  ;;  %v3915_v20 = vld [vmem:[#allocation43_spill] sm:$0xff] }
 0x25c   :  { %v1330_v51 = vmul.f32 %v3915_v20, %v3914_v23  ;;  %v3937_v22 = vld [vmem:[#allocation54_spill] sm:$0xff]  ;;  %v3939_v23 = vld [vmem:[#allocation55_spill] sm:$0xff] }
 0x25d   :  { %1817 = vst.msk [vmem:[%s3758_s3 + $0x50] sm:$0xff] %vm78_vm0, %v1753_v63  ;;  %1824 = vst.msk [vmem:[%s3758_s3 + $0x88] sm:$0xff] %vm78_vm0, %v1760_v58 }
 0x25e   :  { %v1486_v26 = vpop.permute.xlu1 %1485  ;;  %v1521_v10 = vpop.permute.xlu0 %1520 }
 0x25f   :  { %v1755_v47 = vadd.f32 %v1486_v26, %v1307_v17  ;;  %v1762_v39 = vadd.f32 %v1521_v10, %v1314_v54  ;;  %v3916_v26 = vld [vmem:[#allocation19_spill] sm:$0xff]  ;;  %v3917_v10 = vld [vmem:[#allocation44_spill] sm:$0xff] }
 0x261   :  { %1819 = vst.msk [vmem:[%s3758_s3 + $0x60] sm:$0xff] %vm78_vm0, %v1755_v47  ;;  %1826 = vst.msk [vmem:[%s3758_s3 + $0x98] sm:$0xff] %vm78_vm0, %v1762_v39  ;;  %v1325_v47 = vmul.f32 %v3917_v10, %v3916_v26  ;;  %v3918_v39 = vld [vmem:[#allocation24_spill] sm:$0xff] }
 0x262   :  { %v1496_v34 = vpop.permute.xlu1 %1495  ;;  %v1531_v42 = vpop.permute.xlu0 %1530  ;;  %v3941_v26 = vld [vmem:[#allocation56_spill] sm:$0xff] }
 0x263   :  { %v1757_v15 = vadd.f32 %v1496_v34, %v1309_v21  ;;  %v1764_v56 = vadd.f32 %v1531_v42, %v1316_v0  ;;  %v3919_v21 = vld [vmem:[#allocation45_spill] sm:$0xff] }
 0x264   :  { %v1332_v0 = vmul.f32 %v3919_v21, %v3918_v39  ;;  %v3943_v39 = vld [vmem:[#allocation57_spill] sm:$0xff] }
 0x265   :  { %1821 = vst.msk [vmem:[%s3758_s3 + $0x70] sm:$0xff] %vm78_vm0, %v1757_v15  ;;  %1828 = vst.msk [vmem:[%s3758_s3 + $0xa8] sm:$0xff] %vm78_vm0, %v1764_v56 }
 0x266   :  { %v1506_v27 = vpop.permute.xlu1 %1505  ;;  %v1541_v16 = vpop.permute.xlu0 %1540 }
 0x267   :  { %v1759_v43 = vadd.f32 %v1506_v27, %v1311_v25  ;;  %v1766_v53 = vadd.f32 %v1541_v16, %v1318_v30  ;;  %v3920_v25 = vld [vmem:[#allocation21_spill] sm:$0xff]  ;;  %v3921_v30 = vld [vmem:[#allocation46_spill] sm:$0xff] }
 0x268   :  { %v1327_v27 = vmul.f32 %v3921_v30, %v3920_v25  ;;  %v3922_v16 = vld [vmem:[#allocation26_spill] sm:$0xff] }
 0x269   :  { %1823 = vst.msk [vmem:[%s3758_s3 + $0x80] sm:$0xff] %vm78_vm0, %v1759_v43  ;;  %1830 = vst.msk [vmem:[%s3758_s3 + $0xb8] sm:$0xff] %vm78_vm0, %v1766_v53  ;;  %v3923_v43 = vld [vmem:[#allocation47_spill] sm:$0xff]  ;;  %v3945_v25 = vld [vmem:[#allocation58_spill] sm:$0xff] }
 0x26a   :  { %v1516_v19 = vpop.permute.xlu1 %1515  ;;  %v1551_v8 = vpop.permute.xlu0 %1550  ;;  %v1334_v53 = vmul.f32 %v3923_v43, %v3922_v16  ;;  %v3947_v16 = vld [vmem:[#allocation59_spill] sm:$0xff] }
 0x26b   :  { %v1761_v18 = vadd.f32 %v1516_v19, %v1313_v29  ;;  %v1768_v62 = vadd.f32 %v1551_v8, %v1320_v28 }
 0x26d   :  { %1825 = vst.msk [vmem:[%s3758_s3 + $0x90] sm:$0xff] %vm78_vm0, %v1761_v18  ;;  %1832 = vst.msk [vmem:[%s3758_s3 + $0xc8] sm:$0xff] %vm78_vm0, %v1768_v62  ;;  %v3924_v18 = vld [vmem:[#allocation23_spill] sm:$0xff]  ;;  %v3925_v62 = vld [vmem:[#allocation48_spill] sm:$0xff] }
 0x26e   :  { %v1526_v11 = vpop.permute.xlu1 %1525  ;;  %v1561_v7 = vpop.permute.xlu0 %1560 }
 0x26f   :  { %v1763_v3 = vadd.f32 %v1526_v11, %v1315_v33  ;;  %v1770_v57 = vadd.f32 %v1561_v7, %v1322_v32  ;;  %v1329_v33 = vmul.f32 %v3925_v62, %v3924_v18  ;;  %v3926_v32 = vld [vmem:[#allocation28_spill] sm:$0xff]  ;;  %v3927_v11 = vld [vmem:[#allocation49_spill] sm:$0xff] }
 0x270   :  { %v1336_v7 = vmul.f32 %v3927_v11, %v3926_v32  ;;  %v3949_v18 = vld [vmem:[#allocation60_spill] sm:$0xff]  ;;  %v3951_v32 = vld [vmem:[#allocation61_spill] sm:$0xff] }
 0x271   :  { %1827 = vst.msk [vmem:[%s3758_s3 + $0xa0] sm:$0xff] %vm78_vm0, %v1763_v3  ;;  %1834 = vst.msk [vmem:[%s3758_s3 + $0xd8] sm:$0xff] %vm78_vm0, %v1770_v57 }
 0x272   :  { %v1536_v4 = vpop.permute.xlu1 %1535  ;;  %v1571_v6 = vpop.permute.xlu0 %1570 }
 0x273   :  { %v1765_v14 = vadd.f32 %v1536_v4, %v1317_v24  ;;  %v1772_v59 = vadd.f32 %v1571_v6, %v1324_v36  ;;  %v3928_v4 = vld [vmem:[#allocation25_spill] sm:$0xff]  ;;  %v3929_v6 = vld [vmem:[#allocation50_spill] sm:$0xff] }
 0x275   :  { %1829 = vst.msk [vmem:[%s3758_s3 + $0xb0] sm:$0xff] %vm78_vm0, %v1765_v14  ;;  %1836 = vst.msk [vmem:[%s3758_s3 + $0xe8] sm:$0xff] %vm78_vm0, %v1772_v59  ;;  %v1331_v14 = vmul.f32 %v3929_v6, %v3928_v4  ;;  %v3930_v59 = vld [vmem:[#allocation30_spill] sm:$0xff] }
 0x276   :  { %v1546_v61 = vpop.permute.xlu1 %1545  ;;  %v1581_v12 = vpop.permute.xlu0 %1580  ;;  %v3953_v4 = vld [vmem:[#allocation62_spill] sm:$0xff] }
 0x277   :  { %v1767_v31 = vadd.f32 %v1546_v61, %v1319_v41  ;;  %v1774_v46 = vadd.f32 %v1581_v12, %v1326_v1  ;;  %v3931_v41 = vld [vmem:[#allocation51_spill] sm:$0xff] }
 0x278   :  { %v1338_v35 = vmul.f32 %v3931_v41, %v3930_v59  ;;  %v3955_v59 = vld [vmem:[#allocation63_spill] sm:$0xff] }
 0x279   :  { %1831 = vst.msk [vmem:[%s3758_s3 + $0xc0] sm:$0xff] %vm78_vm0, %v1767_v31  ;;  %1838 = vst.msk [vmem:[%s3758_s3 + $0xf8] sm:$0xff] %vm78_vm0, %v1774_v46  ;;  %v3932_v46 = vld [vmem:[#allocation27_spill] sm:$0xff] }
 0x27a   :  { %v1556_v38 = vpop.permute.xlu1 %1555  ;;  %v1591_v55 = vpop.permute.xlu0 %1590  ;;  %v1333_v40 = vmul.f32 %v3933_v49, %v3932_v46  ;;  %v3957_v46 = vld [vmem:[#allocation64_spill] sm:$0xff] }
 0x27b   :  { %v1769_v60 = vadd.f32 %v1556_v38, %v1321_v45  ;;  %v1776_v50 = vadd.f32 %v1591_v55, %v1328_v5  ;;  %v3934_v45 = vld [vmem:[#allocation32_spill] sm:$0xff] }
 0x27c   :  { %v1340_v2 = vmul.f32 %v3935_v52, %v3934_v45  ;;  %v3959_v45 = vld [vmem:[#allocation65_spill] sm:$0xff] }
 0x27d   :  { %1833 = vst.msk [vmem:[%s3758_s3 + $0xd0] sm:$0xff] %vm78_vm0, %v1769_v60  ;;  %1840 = vst.msk [vmem:[%s3758_s3 + $0x108] sm:$0xff] %vm78_vm0, %v1776_v50  ;;  %v3936_v50 = vld [vmem:[#allocation29_spill] sm:$0xff] }
 0x27e   :  { %v1566_v63 = vpop.permute.xlu1 %1565  ;;  %v1601_v58 = vpop.permute.xlu0 %1600  ;;  %v1335_v37 = vmul.f32 %v3937_v22, %v3936_v50  ;;  %v3961_v50 = vld [vmem:[#allocation66_spill] sm:$0xff] }
 0x27f   :  { %v1771_v17 = vadd.f32 %v1566_v63, %v1323_v13  ;;  %v1778_v54 = vadd.f32 %v1601_v58, %v1330_v51  ;;  %v3938_v13 = vld [vmem:[#allocation34_spill] sm:$0xff] }
 0x280   :  { %v1342_v20 = vmul.f32 %v3939_v23, %v3938_v13  ;;  %v3963_v13 = vld [vmem:[#allocation67_spill] sm:$0xff] }
 0x281   :  { %1835 = vst.msk [vmem:[%s3758_s3 + $0xe0] sm:$0xff] %vm78_vm0, %v1771_v17  ;;  %1842 = vst.msk [vmem:[%s3758_s3 + $0x118] sm:$0xff] %vm78_vm0, %v1778_v54  ;;  %v3940_v54 = vld [vmem:[#allocation31_spill] sm:$0xff] }
 0x282   :  { %v1576_v34 = vpop.permute.xlu1 %1575  ;;  %v1611_v42 = vpop.permute.xlu0 %1610  ;;  %v1337_v10 = vmul.f32 %v3941_v26, %v3940_v54  ;;  %v3965_v54 = vld [vmem:[#allocation68_spill] sm:$0xff] }
 0x283   :  { %v1773_v15 = vadd.f32 %v1576_v34, %v1325_v47  ;;  %v1780_v56 = vadd.f32 %v1611_v42, %v1332_v0  ;;  %v3942_v47 = vld [vmem:[#allocation36_spill] sm:$0xff] }
 0x284   :  { %v1344_v21 = vmul.f32 %v3943_v39, %v3942_v47  ;;  %v3967_v47 = vld [vmem:[#allocation69_spill] sm:$0xff] }
 0x285   :  { %1837 = vst.msk [vmem:[%s3758_s3 + $0xf0] sm:$0xff] %vm78_vm0, %v1773_v15  ;;  %1844 = vst.msk [vmem:[%s3758_s3 + $0x128] sm:$0xff] %vm78_vm0, %v1780_v56  ;;  %v3944_v56 = vld [vmem:[#allocation33_spill] sm:$0xff] }
 0x286   :  { %v1586_v29 = vpop.permute.xlu1 %1585  ;;  %v1621_v28 = vpop.permute.xlu0 %1620  ;;  %v1339_v30 = vmul.f32 %v3945_v25, %v3944_v56  ;;  %v3969_v56 = vld [vmem:[#allocation70_spill] sm:$0xff] }
 0x287   :  { %v1775_v19 = vadd.f32 %v1586_v29, %v1327_v27  ;;  %v1782_v8 = vadd.f32 %v1621_v28, %v1334_v53  ;;  %v3946_v27 = vld [vmem:[#allocation2_spill] sm:$0xff] }
 0x288   :  { %v1346_v43 = vmul.f32 %v3947_v16, %v3946_v27 }
 0x289   :  { %1839 = vst.msk [vmem:[%s3758_s3 + $0x100] sm:$0xff] %vm78_vm0, %v1775_v19  ;;  %1846 = vst.msk [vmem:[%s3758_s3 + $0x138] sm:$0xff] %vm78_vm0, %v1782_v8  ;;  %v3948_v8 = vld [vmem:[#allocation35_spill] sm:$0xff] }
 0x28a   :  { %v1596_v3 = vpop.permute.xlu1 %1595  ;;  %v1631_v57 = vpop.permute.xlu0 %1630  ;;  %v1341_v62 = vmul.f32 %v3949_v18, %v3948_v8  ;;  %v3972_v18 = vld [vmem:[#allocation13_spill] sm:$0xff] }
 0x28b   :  { %v1777_v24 = vadd.f32 %v1596_v3, %v1329_v33  ;;  %v1784_v36 = vadd.f32 %v1631_v57, %v1336_v7  ;;  %v3950_v33 = vld [vmem:[#allocation4_spill] sm:$0xff] }
 0x28c   :  { %v1348_v11 = vmul.f32 %v3951_v32, %v3950_v33  ;;  %v3973_v32 = vld [vmem:[#allocation38_spill] sm:$0xff] }
 0x28d   :  { %1841 = vst.msk [vmem:[%s3758_s3 + $0x110] sm:$0xff] %vm78_vm0, %v1777_v24  ;;  %1848 = vst.msk [vmem:[%s3758_s3 + $0x148] sm:$0xff] %vm78_vm0, %v1784_v36  ;;  %v3952_v36 = vld [vmem:[#allocation37_spill] sm:$0xff] }
 0x28e   :  { %v1606_v1 = vpop.permute.xlu1 %1605  ;;  %v1641_v61 = vpop.permute.xlu0 %1640  ;;  %v1343_v6 = vmul.f32 %v3953_v4, %v3952_v36 }
 0x28f   :  { %v1779_v12 = vadd.f32 %v1606_v1, %v1331_v14  ;;  %v1786_v31 = vadd.f32 %v1641_v61, %v1338_v35  ;;  %v3954_v14 = vld [vmem:[#allocation6_spill] sm:$0xff] }
 0x290   :  { %v1350_v41 = vmul.f32 %v3955_v59, %v3954_v14 }
 0x291   :  { %1843 = vst.msk [vmem:[%s3758_s3 + $0x120] sm:$0xff] %vm78_vm0, %v1779_v12  ;;  %1850 = vst.msk [vmem:[%s3758_s3 + $0x158] sm:$0xff] %vm78_vm0, %v1786_v31  ;;  %v3956_v31 = vld [vmem:[#allocation3_spill] sm:$0xff] }
 0x292   :  { %v1616_v5 = vpop.permute.xlu1 %1615  ;;  %v1651_v38 = vpop.permute.xlu0 %1650  ;;  %v1345_v49 = vmul.f32 %v3957_v46, %v3956_v31 }
 0x293   :  { %v1781_v55 = vadd.f32 %v1616_v5, %v1333_v40  ;;  %v1788_v60 = vadd.f32 %v1651_v38, %v1340_v2  ;;  %v3958_v40 = vld [vmem:[#allocation8_spill] sm:$0xff] }
 0x294   :  { %v1352_v52 = vmul.f32 %v3959_v45, %v3958_v40 }
 0x295   :  { %1845 = vst.msk [vmem:[%s3758_s3 + $0x130] sm:$0xff] %vm78_vm0, %v1781_v55  ;;  %1852 = vst.msk [vmem:[%s3758_s3 + $0x168] sm:$0xff] %vm78_vm0, %v1788_v60  ;;  %v3960_v60 = vld [vmem:[#allocation5_spill] sm:$0xff] }
 0x296   :  { %v1626_v51 = vpop.permute.xlu1 %1625  ;;  %v1661_v63 = vpop.permute.xlu0 %1660  ;;  %v1347_v22 = vmul.f32 %v3961_v50, %v3960_v60 }
 0x297   :  { %v1783_v58 = vadd.f32 %v1626_v51, %v1335_v37  ;;  %v1790_v17 = vadd.f32 %v1661_v63, %v1342_v20  ;;  %v3962_v37 = vld [vmem:[#allocation10_spill] sm:$0xff] }
 0x298   :  { %v1354_v23 = vmul.f32 %v3963_v13, %v3962_v37 }
 0x299   :  { %1847 = vst.msk [vmem:[%s3758_s3 + $0x140] sm:$0xff] %vm78_vm0, %v1783_v58  ;;  %1854 = vst.msk [vmem:[%s3758_s3 + $0x178] sm:$0xff] %vm78_vm0, %v1790_v17  ;;  %v3964_v17 = vld [vmem:[#allocation7_spill] sm:$0xff] }
 0x29a   :  { %v1636_v0 = vpop.permute.xlu1 %1635  ;;  %v1671_v34 = vpop.permute.xlu0 %1670  ;;  %v1349_v26 = vmul.f32 %v3965_v54, %v3964_v17 }
 0x29b   :  { %v1785_v42 = vadd.f32 %v1636_v0, %v1337_v10  ;;  %v1792_v15 = vadd.f32 %v1671_v34, %v1344_v21  ;;  %v3966_v10 = vld [vmem:[#allocation12_spill] sm:$0xff] }
 0x29c   :  { %v1356_v39 = vmul.f32 %v3967_v47, %v3966_v10 }
 0x29d   :  { %1849 = vst.msk [vmem:[%s3758_s3 + $0x150] sm:$0xff] %vm78_vm0, %v1785_v42  ;;  %1856 = vst.msk [vmem:[%s3758_s3 + $0x188] sm:$0xff] %vm78_vm0, %v1792_v15  ;;  %v3968_v15 = vld [vmem:[#allocation9_spill] sm:$0xff] }
 0x29e   :  { %v1646_v53 = vpop.permute.xlu1 %1645  ;;  %v1681_v29 = vpop.permute.xlu0 %1680  ;;  %v1351_v25 = vmul.f32 %v3969_v56, %v3968_v15 }
 0x29f   :  { %v1787_v28 = vadd.f32 %v1646_v53, %v1339_v30  ;;  %v1794_v19 = vadd.f32 %v1681_v29, %v1346_v43  ;;  %v3970_v30 = vld [vmem:[#allocation14_spill] sm:$0xff] }
 0x2a0   :  { %v1358_v27 = vmul.f32 %v3354_v9, %v3970_v30 }
 0x2a1   :  { %1851 = vst.msk [vmem:[%s3758_s3 + $0x160] sm:$0xff] %vm78_vm0, %v1787_v28  ;;  %1858 = vst.msk [vmem:[%s3758_s3 + $0x198] sm:$0xff] %vm78_vm0, %v1794_v19  ;;  %v3971_v28 = vld [vmem:[#allocation11_spill] sm:$0xff] }
 0x2a2   :  { %v1656_v7 = vpop.permute.xlu1 %1655  ;;  %v1691_v3 = vpop.permute.xlu0 %1690  ;;  %v1353_v19 = vmul.f32 %v3361_v48, %v3971_v28 }
 0x2a3   :  { %v1789_v57 = vadd.f32 %v1656_v7, %v1341_v62  ;;  %v1796_v24 = vadd.f32 %v1691_v3, %v1348_v11  ;;  %v1355_v62 = vmul.f32 %v3372_v44, %v3972_v18  ;;  %v3974_v11 = vld [vmem:[#allocation71_spill] sm:$0xff] }
 0x2a4   :  { %v1357_v7 = vmul.f32 %v3974_v11, %v3973_v32 }
 0x2a5   :  { %1853 = vst.msk [vmem:[%s3758_s3 + $0x170] sm:$0xff] %vm78_vm0, %v1789_v57  ;;  %1860 = vst.msk [vmem:[%s3758_s3 + $0x1a8] sm:$0xff] %vm78_vm0, %v1796_v24 }
 0x2a6   :  { %v1666_v35 = vpop.permute.xlu1 %1665  ;;  %v1701_v1 = vpop.permute.xlu0 %1700 }
 0x2a7   :  { %v1791_v61 = vadd.f32 %v1666_v35, %v1343_v6  ;;  %v1798_v12 = vadd.f32 %v1701_v1, %v1350_v41 }
 0x2a9   :  { %1855 = vst.msk [vmem:[%s3758_s3 + $0x180] sm:$0xff] %vm78_vm0, %v1791_v61  ;;  %1862 = vst.msk [vmem:[%s3758_s3 + $0x1b8] sm:$0xff] %vm78_vm0, %v1798_v12 }
 0x2aa   :  { %v1676_v2 = vpop.permute.xlu1 %1675  ;;  %v1711_v5 = vpop.permute.xlu0 %1710 }
 0x2ab   :  { %v1793_v38 = vadd.f32 %v1676_v2, %v1345_v49  ;;  %v1800_v55 = vadd.f32 %v1711_v5, %v1352_v52 }
 0x2ad   :  { %1857 = vst.msk [vmem:[%s3758_s3 + $0x190] sm:$0xff] %vm78_vm0, %v1793_v38  ;;  %1864 = vst.msk [vmem:[%s3758_s3 + $0x1c8] sm:$0xff] %vm78_vm0, %v1800_v55 }
 0x2ae   :  { %v1686_v20 = vpop.permute.xlu1 %1685  ;;  %v1721_v51 = vpop.permute.xlu0 %1720 }
 0x2af   :  { %v1795_v63 = vadd.f32 %v1686_v20, %v1347_v22  ;;  %v1802_v58 = vadd.f32 %v1721_v51, %v1354_v23 }
 0x2b1   :  { %1859 = vst.msk [vmem:[%s3758_s3 + $0x1a0] sm:$0xff] %vm78_vm0, %v1795_v63  ;;  %1866 = vst.msk [vmem:[%s3758_s3 + $0x1d8] sm:$0xff] %vm78_vm0, %v1802_v58 }
 0x2b2   :  { %v1696_v21 = vpop.permute.xlu1 %1695  ;;  %v1731_v0 = vpop.permute.xlu0 %1730 }
 0x2b3   :  { %v1797_v34 = vadd.f32 %v1696_v21, %v1349_v26  ;;  %v1804_v42 = vadd.f32 %v1731_v0, %v1356_v39 }
 0x2b5   :  { %1861 = vst.msk [vmem:[%s3758_s3 + $0x1b0] sm:$0xff] %vm78_vm0, %v1797_v34  ;;  %1868 = vst.msk [vmem:[%s3758_s3 + $0x1e8] sm:$0xff] %vm78_vm0, %v1804_v42 }
 0x2b6   :  { %v1706_v16 = vpop.permute.xlu1 %1705  ;;  %v1741_v43 = vpop.permute.xlu0 %1740 }
 0x2b7   :  { %v1799_v53 = vadd.f32 %v1706_v16, %v1351_v25  ;;  %v1806_v29 = vadd.f32 %v1741_v43, %v1358_v27 }
 0x2b9   :  { %1863 = vst.msk [vmem:[%s3758_s3 + $0x1c0] sm:$0xff] %vm78_vm0, %v1799_v53  ;;  %1870 = vst.msk [vmem:[%s3758_s3 + $0x1f8] sm:$0xff] %vm78_vm0, %v1806_v29 }
 0x2ba   :  { %v1716_v9 = vpop.permute.xlu1 %1715 }
 0x2bb   :  { %v1801_v8 = vadd.f32 %v1716_v9, %v1353_v19 }
 0x2bd   :  { %1865 = vst.msk [vmem:[%s3758_s3 + $0x1d0] sm:$0xff] %vm78_vm0, %v1801_v8 }
 0x2be   :  { %v1726_v48 = vpop.permute.xlu1 %1725 }
 0x2bf   :  { %v1803_v33 = vadd.f32 %v1726_v48, %v1355_v62 }
 0x2c1   :  { %1867 = vst.msk [vmem:[%s3758_s3 + $0x1e0] sm:$0xff] %vm78_vm0, %v1803_v33 }
 0x2c2   :  { %v1736_v3 = vpop.permute.xlu1 %1735 }
 0x2c3   :  { %v1805_v57 = vadd.f32 %v1736_v3, %v1357_v7 }
 0x2c5   :  { %1869 = vst.msk [vmem:[%s3758_s3 + $0x1f0] sm:$0xff] %vm78_vm0, %v1805_v57 }

</bundles_post_ra>
